<compile_context>
chip_gen: v7x
topology: tpu7x:2x2x1
jax: 0.10.0
libtpu: 0.0.40
codegen_flags: <defaults>
</compile_context>

<pallas_src>
import numpy as np
import jax
import jax.numpy as jnp
from jax import lax
from jax.experimental import pallas as pl
from jax.experimental.pallas import tpu as pltpu

QUAN_WIDTH = 16
QMAX = float(2.0 ** (QUAN_WIDTH - 1) - 1.0)
QMIN = float(-(2.0 ** (QUAN_WIDTH - 1)))
BN_EPS = 1e-5
CONV_MXU_DTYPE = jnp.float32   # flip to jnp.bfloat16 at production sizes (see TODO)


# ----------------------------------------------------------------------------
# Pure-JAX fake quantize (reference only; the kernel has its own in-kernel copy)
# ----------------------------------------------------------------------------
def _fake_quantize_ref(x, bits=QUAN_WIDTH):
    qmax = float(2.0 ** (bits - 1) - 1.0)
    qmin = float(-(2.0 ** (bits - 1)))
    amax = jnp.max(jnp.abs(x))
    scale = amax / qmax
    scale = jnp.where(scale > 0.0, scale, jnp.float32(1.0))
    q = jnp.clip(jnp.round(x / scale), qmin, qmax)
    return q * scale


# ----------------------------------------------------------------------------
# Wrapper-side weight plumbing: 3x3 HWIO conv -> one fused band matrix
# ----------------------------------------------------------------------------
def _fused_conv_weights(w_hwio, W):
    """(3,3,Cin,Cout) HWIO -> (4*W*Cin, 2*W*Cout) band matrix for the row-pair layout.

    Slab K chunks (per output row-pair, base image row 2p):
      chunk 0: input row 2p   (dy=0)   chunk 1: input row 2p+1 (dy=1)
      chunk 2: input row 2p-1 (dy=-1)  chunk 3: input row 2p+2 (dy=2)
    Output lane col = r*W*Cout + wo*Cout + co (r in {0,1} = row within the pair).
    T[k, col] = w[ky, kx, ci, co] with ky = dy - r + 1, kx = wi - wo + 1 when both are
    in [0, 2], else 0 — out-of-range taps are simply dropped, which IS the 'same'
    zero padding along W (no lane halo needed at all)."""
    Cin, Cout = w_hwio.shape[2], w_hwio.shape[3]
    K, Ncol = 4 * W * Cin, 2 * W * Cout
    dy_of_chunk = np.array([0, 1, -1, 2])

    k = np.arange(K)
    chunk, rem = k // (W * Cin), k % (W * Cin)
    wi, ci = rem // Cin, rem % Cin
    col = np.arange(Ncol)
    r, rem2 = col // (W * Cout), col % (W * Cout)
    wo, co = rem2 // Cout, rem2 % Cout

    ky = dy_of_chunk[chunk][:, None] - r[None, :] + 1          # (K, Ncol)
    kx = wi[:, None] - wo[None, :] + 1                         # (K, Ncol)
    valid = (ky >= 0) & (ky <= 2) & (kx >= 0) & (kx <= 2)
    kyc, kxc = np.clip(ky, 0, 2), np.clip(kx, 0, 2)

    gathered = w_hwio[kyc, kxc, ci[:, None], co[None, :]]      # (K, Ncol)
    t = jnp.where(jnp.asarray(valid), gathered, 0.0)
    return t.astype(CONV_MXU_DTYPE)


# ----------------------------------------------------------------------------
# Fused Pallas kernel
# ----------------------------------------------------------------------------
def _make_kernel(N, H, W, C):
    HP = H // 2                 # row pairs per image
    NR = N * HP                 # rows of the packed layout
    WC = W * C                  # lanes per image row
    L = 2 * WC                  # lanes per packed row pair (= 128 at the test shape)

    def fq(x):
        # Symmetric per-tensor fake quantization. The scalar reciprocal is an EUP
        # approx seed + one Newton step (keeps the result ~bit-equal to 1/scale).
        amax = jnp.max(jnp.abs(x), axis=0, keepdims=True)
        amax = jnp.max(amax, axis=1, keepdims=True)                     # (1, 1)
        scale = amax * (1.0 / QMAX)
        scale = jnp.where(scale > 0.0, scale, jnp.float32(1.0))
        inv = pl.reciprocal(scale, approx=True)
        inv = inv * (2.0 - scale * inv)                                 # Newton refine
        q = jnp.clip(jnp.round(x * inv), QMIN, QMAX)
        return q * scale

    def bn(x, pn, gamma, beta):
        # One-pass batch statistics; the two stat rows share ONE matmul against the
        # (pre-divided) per-channel gather matrix pn.
        s1 = jnp.sum(x, axis=0, keepdims=True)                          # (1, L)
        s2 = jnp.sum(x * x, axis=0, keepdims=True)                      # (1, L)
        stats = jnp.concatenate([s1, s2], axis=0)                       # (2, L)
        statsb = jnp.dot(stats, pn, preferred_element_type=jnp.float32)
        mean = statsb[0:1, :]
        var = jnp.maximum(statsb[1:2, :] - mean * mean, 0.0)            # clamp (review)
        return (x - mean) * lax.rsqrt(var + BN_EPS) * gamma + beta

    def conv(x2, t, mask_top, mask_bot):
        # Build the K = 4*W*C slab on register values (no scratch, no Ref slices):
        #   [ current pair (128) | prev row (64) | next row (64) ]
        # Boundary rows are zeroed with the per-image masks.
        zrow = jnp.zeros((1, WC), jnp.float32)
        prev_hi = jnp.concatenate([zrow, x2[:NR - 1, WC:L]], axis=0) * mask_top
        next_lo = jnp.concatenate([x2[1:, 0:WC], zrow], axis=0) * mask_bot
        slab = jnp.concatenate([x2, prev_hi, next_lo], axis=1)          # (NR, 4*WC)
        return jnp.dot(slab.astype(t.dtype), t, preferred_element_type=jnp.float32)

    def kernel(x_ref, t1_ref, t2_ref, g1_ref, b1_ref, g2_ref, b2_ref, pn_ref, out_ref):
        ridx = lax.broadcasted_iota(jnp.int32, (NR, 1), 0)
        mask_top = (ridx % HP != 0).astype(jnp.float32)       # first pair-row of image
        mask_bot = (ridx % HP != HP - 1).astype(jnp.float32)  # last pair-row of image

        # FakeQuantize(x); residual stays in registers/VMEM (never round-trips to HBM).
        xq = fq(x_ref[...])                                   # (NR, L)

        out = conv(xq, t1_ref[...], mask_top, mask_bot)       # conv1 (one MXU dot)
        out = fq(out)
        out = bn(out, pn_ref[...], g1_ref[...], b1_ref[...])
        out = fq(out)
        out = jnp.maximum(out, 0.0)                           # ReLU

        out = conv(out, t2_ref[...], mask_top, mask_bot)      # conv2 (one MXU dot)
        out = fq(out)
        out = bn(out, pn_ref[...], g2_ref[...], b2_ref[...])
        out = fq(out)

        out_ref[...] = jnp.maximum(out + xq, 0.0)             # residual + ReLU, 128-lane store

    return kernel


# ----------------------------------------------------------------------------
# Wrappers
# ----------------------------------------------------------------------------
def basic_block_forward_packed(x2, params, N, H, W):
    """x2: (N*H/2, 2*W*Cin) row-pair-packed NHWC activations.  Returns same layout.
    This is the layout stacked blocks should chain in (no NCHW transposes between
    layers)."""
    w1, g1, b1, w2, g2, b2 = params
    Cin, Cout = w1.shape[2], w1.shape[3]
    # stride=1, downsample=None BasicBlock => identity residual requires Cin == Cout.
    assert Cin == Cout and w2.shape[2] == Cout and w2.shape[3] == Cout
    assert H % 2 == 0
    L = 2 * W * Cout

    t1 = _fused_conv_weights(w1.astype(jnp.float32), W)        # (4*W*Cin, 2*W*Cout)
    t2 = _fused_conv_weights(w2.astype(jnp.float32), W)

    # Per-channel gather/broadcast matrix for BN stats in the packed layout,
    # pre-divided by the per-channel element count N*H*W.
    lane = np.arange(L)
    pn = jnp.asarray((lane[:, None] % Cout == lane[None, :] % Cout).astype(np.float32))
    pn = pn / float(N * H * W)

    def tile_vec(v):
        return jnp.tile(v.reshape(-1).astype(jnp.float32), 2 * W).reshape(1, L)

    g1t, b1t, g2t, b2t = tile_vec(g1), tile_vec(b1), tile_vec(g2), tile_vec(b2)

    vmem = pl.BlockSpec(memory_space=pltpu.MemorySpace.VMEM)
    return pl.pallas_call(
        _make_kernel(N, H, W, Cin),
        out_shape=jax.ShapeDtypeStruct((N * H // 2, L), jnp.float32),
        in_specs=[vmem] * 8,
        out_specs=vmem,
    )(x2, t1, t2, g1t, b1t, g2t, b2t, pn)


def basic_block_forward(x_nchw, params):
    """NCHW-in / NCHW-out wrapper matching the PyTorch module interface.  The
    transposes here are interface plumbing only; chain blocks via the packed entry
    point to avoid them."""
    N, Cin, H, W = x_nchw.shape
    Cout = params[0].shape[3]
    x = jnp.transpose(x_nchw, (0, 2, 3, 1)).astype(jnp.float32)        # NHWC
    x2 = x.reshape(N * H // 2, 2 * W * Cin)                            # pure reshape
    out2 = basic_block_forward_packed(x2, params, N, H, W)
    return jnp.transpose(out2.reshape(N, H, W, Cout), (0, 3, 1, 2))    # back to NCHW


# ----------------------------------------------------------------------------
# Pure-JAX reference (for correctness check)
# ----------------------------------------------------------------------------
def basic_block_reference(x_nchw, params):
    w1, g1, b1, w2, g2, b2 = params
    x = jnp.transpose(x_nchw, (0, 2, 3, 1)).astype(jnp.float32)

    def conv(inp, w):
        return lax.conv_general_dilated(
            inp, w, window_strides=(1, 1), padding=((1, 1), (1, 1)),
            dimension_numbers=("NHWC", "HWIO", "NHWC"),
            precision=lax.Precision.HIGHEST)

    def bn(inp, gamma, beta):
        n = inp.shape[0] * inp.shape[1] * inp.shape[2]
        s1 = jnp.sum(inp, axis=(0, 1, 2), keepdims=True)
        s2 = jnp.sum(inp * inp, axis=(0, 1, 2), keepdims=True)
        mean = s1 / n
        var = jnp.maximum(s2 / n - mean * mean, 0.0)
        return ((inp - mean) * lax.rsqrt(var + BN_EPS)
                * gamma.reshape(1, 1, 1, -1) + beta.reshape(1, 1, 1, -1))

    xq = _fake_quantize_ref(x)
    residual = xq
    out = conv(xq, w1)
    out = _fake_quantize_ref(out)
    out = bn(out, g1, b1)
    out = _fake_quantize_ref(out)
    out = jnp.maximum(out, 0.0)
    out = conv(out, w2)
    out = _fake_quantize_ref(out)
    out = bn(out, g2, b2)
    out = _fake_quantize_ref(out)
    out = out + residual
    out = jnp.maximum(out, 0.0)
    return jnp.transpose(out, (0, 3, 1, 2))


# ----------------------------------------------------------------------------
if __name__ == "__main__":
    key = jax.random.PRNGKey(0)
    N, Cin, H, W = 2, 4, 16, 16     # stride=1, downsample=None -> planes == inplanes
    planes = 4
    k = jax.random.split(key, 7)

    x = jax.random.normal(k[0], (N, Cin, H, W), jnp.float32)              # NCHW input
    w1 = 0.1 * jax.random.normal(k[1], (3, 3, Cin, planes), jnp.float32)  # HWIO
    w2 = 0.1 * jax.random.normal(k[2], (3, 3, planes, planes), jnp.float32)
    g1 = 1.0 + 0.1 * jax.random.normal(k[3], (planes,), jnp.float32)
    b1 = 0.1 * jax.random.normal(k[4], (planes,), jnp.float32)
    g2 = 1.0 + 0.1 * jax.random.normal(k[5], (planes,), jnp.float32)
    b2 = 0.1 * jax.random.normal(k[6], (planes,), jnp.float32)
    params = (w1, g1, b1, w2, g2, b2)

    out = jax.block_until_ready(jax.jit(basic_block_forward)(x, params))
    ref = jax.block_until_ready(jax.jit(basic_block_reference)(x, params))

    assert out.shape == (N, planes, H, W), out.shape
    max_err = float(jnp.max(jnp.abs(out - ref)))
    # f32 MXU keeps the kernel bit-close to the f32 reference; allow more slack if the
    # bf16 MXU path (CONV_MXU_DTYPE) is enabled.
    tol = 1e-2 if CONV_MXU_DTYPE == jnp.float32 else 6e-2
    assert max_err < tol, f"mismatch vs reference, max abs err = {max_err}"
    print("KERNEL_OK")
</pallas_src>

<mosaic_0001>
module attributes {stable_mosaic.version = 11 : i64} {
  func.func @kernel(%arg0: memref<16x128xf32, #tpu.memory_space<vmem>>, %arg1: memref<256x128xf32, #tpu.memory_space<vmem>>, %arg2: memref<256x128xf32, #tpu.memory_space<vmem>>, %arg3: memref<1x128xf32, #tpu.memory_space<vmem>>, %arg4: memref<1x128xf32, #tpu.memory_space<vmem>>, %arg5: memref<1x128xf32, #tpu.memory_space<vmem>>, %arg6: memref<1x128xf32, #tpu.memory_space<vmem>>, %arg7: memref<128x128xf32, #tpu.memory_space<vmem>>, %arg8: memref<16x128xf32, #tpu.memory_space<vmem>>) attributes {dimension_semantics = [], scalar_prefetch = 0 : i64, scratch_operands = 0 : i64, tpu.core_type = #tpu.core_type<tc>} {
    %0 = tpu.iota {dimensions = array<i32: 0>} : vector<16x1xi32>
    %c8_i32 = arith.constant 8 : i32
    %c0_i32 = arith.constant 0 : i32
    %1 = arith.cmpi eq, %c8_i32, %c0_i32 : i32
    %c1_i32 = arith.constant 1 : i32
    %2 = arith.select %1, %c1_i32, %c8_i32 : i32
    %3 = vector.broadcast %2 : i32 to vector<16x1xi32>
    %4 = arith.remsi %0, %3 : vector<16x1xi32>
    %c0_i32_0 = arith.constant 0 : i32
    %5 = vector.broadcast %c0_i32_0 : i32 to vector<16x1xi32>
    %6 = arith.cmpi ne, %4, %5 : vector<16x1xi32>
    %c0_i32_1 = arith.constant 0 : i32
    %7 = vector.broadcast %c0_i32_1 : i32 to vector<16x1xi32>
    %8 = arith.cmpi slt, %4, %7 : vector<16x1xi32>
    %c0_i32_2 = arith.constant 0 : i32
    %9 = arith.cmpi slt, %2, %c0_i32_2 : i32
    %10 = vector.broadcast %9 : i1 to vector<16x1xi1>
    %11 = vector.broadcast %10 : vector<16x1xi1> to vector<16x1xi1>
    %12 = arith.xori %8, %11 : vector<16x1xi1>
    %13 = arith.andi %12, %6 : vector<16x1xi1>
    %14 = vector.broadcast %2 : i32 to vector<16x1xi32>
    %15 = arith.addi %4, %14 : vector<16x1xi32>
    %16 = arith.select %13, %15, %4 : vector<16x1xi1>, vector<16x1xi32>
    %c0_i32_3 = arith.constant 0 : i32
    %17 = vector.broadcast %c0_i32_3 : i32 to vector<16x1xi32>
    %18 = arith.cmpi ne, %16, %17 : vector<16x1xi32>
    %19 = arith.extui %18 : vector<16x1xi1> to vector<16x1xi32>
    %20 = arith.sitofp %19 : vector<16x1xi32> to vector<16x1xf32>
    %c8_i32_4 = arith.constant 8 : i32
    %c0_i32_5 = arith.constant 0 : i32
    %21 = arith.cmpi eq, %c8_i32_4, %c0_i32_5 : i32
    %c1_i32_6 = arith.constant 1 : i32
    %22 = arith.select %21, %c1_i32_6, %c8_i32_4 : i32
    %23 = vector.broadcast %22 : i32 to vector<16x1xi32>
    %24 = arith.remsi %0, %23 : vector<16x1xi32>
    %c0_i32_7 = arith.constant 0 : i32
    %25 = vector.broadcast %c0_i32_7 : i32 to vector<16x1xi32>
    %26 = arith.cmpi ne, %24, %25 : vector<16x1xi32>
    %c0_i32_8 = arith.constant 0 : i32
    %27 = vector.broadcast %c0_i32_8 : i32 to vector<16x1xi32>
    %28 = arith.cmpi slt, %24, %27 : vector<16x1xi32>
    %c0_i32_9 = arith.constant 0 : i32
    %29 = arith.cmpi slt, %22, %c0_i32_9 : i32
    %30 = vector.broadcast %29 : i1 to vector<16x1xi1>
    %31 = vector.broadcast %30 : vector<16x1xi1> to vector<16x1xi1>
    %32 = arith.xori %28, %31 : vector<16x1xi1>
    %33 = arith.andi %32, %26 : vector<16x1xi1>
    %34 = vector.broadcast %22 : i32 to vector<16x1xi32>
    %35 = arith.addi %24, %34 : vector<16x1xi32>
    %36 = arith.select %33, %35, %24 : vector<16x1xi1>, vector<16x1xi32>
    %c7_i32 = arith.constant 7 : i32
    %37 = vector.broadcast %c7_i32 : i32 to vector<16x1xi32>
    %38 = arith.cmpi ne, %36, %37 : vector<16x1xi32>
    %39 = arith.extui %38 : vector<16x1xi1> to vector<16x1xi32>
    %40 = arith.sitofp %39 : vector<16x1xi32> to vector<16x1xf32>
    %c0 = arith.constant 0 : index
    %c0_10 = arith.constant 0 : index
    %41 = vector.load %arg0[%c0, %c0_10] : memref<16x128xf32, #tpu.memory_space<vmem>>, vector<16x128xf32>
    %42 = math.absf %41 : vector<16x128xf32>
    %cst = arith.constant dense<0xFF800000> : vector<128xf32>
    %43 = vector.multi_reduction <maximumf>, %42, %cst [0] : vector<16x128xf32> to vector<128xf32>
    %44 = vector.shape_cast %43 : vector<128xf32> to vector<1x128xf32>
    %cst_11 = arith.constant dense<0xFF800000> : vector<1xf32>
    %45 = vector.multi_reduction <maximumf>, %44, %cst_11 [1] : vector<1x128xf32> to vector<1xf32>
    %46 = vector.shape_cast %45 : vector<1xf32> to vector<1x1xf32>
    %cst_12 = arith.constant 3.05185094E-5 : f32
    %47 = vector.broadcast %cst_12 : f32 to vector<1x1xf32>
    %48 = arith.mulf %46, %47 : vector<1x1xf32>
    %cst_13 = arith.constant 0.000000e+00 : f32
    %49 = vector.broadcast %cst_13 : f32 to vector<1x1xf32>
    %50 = arith.cmpf ogt, %48, %49 : vector<1x1xf32>
    %cst_14 = arith.constant 1.000000e+00 : f32
    %51 = vector.broadcast %cst_14 : f32 to vector<1x1xf32>
    %52 = arith.select %50, %48, %51 : vector<1x1xi1>, vector<1x1xf32>
    %53 = tpu.reciprocal %52 {approx = true} : vector<1x1xf32> -> vector<1x1xf32>
    %54 = arith.mulf %52, %53 : vector<1x1xf32>
    %cst_15 = arith.constant 2.000000e+00 : f32
    %55 = vector.broadcast %cst_15 : f32 to vector<1x1xf32>
    %56 = arith.subf %55, %54 : vector<1x1xf32>
    %57 = arith.mulf %53, %56 : vector<1x1xf32>
    %58 = vector.broadcast %57 : vector<1x1xf32> to vector<16x128xf32>
    %59 = arith.mulf %41, %58 : vector<16x128xf32>
    %60 = math.roundeven %59 : vector<16x128xf32>
    %cst_16 = arith.constant -3.276800e+04 : f32
    %cst_17 = arith.constant 3.276700e+04 : f32
    %61 = vector.broadcast %cst_16 : f32 to vector<16x128xf32>
    %62 = arith.maximumf %61, %60 : vector<16x128xf32>
    %63 = vector.broadcast %cst_17 : f32 to vector<16x128xf32>
    %64 = arith.minimumf %63, %62 : vector<16x128xf32>
    %65 = vector.broadcast %52 : vector<1x1xf32> to vector<16x128xf32>
    %66 = arith.mulf %64, %65 : vector<16x128xf32>
    %c0_18 = arith.constant 0 : index
    %c0_19 = arith.constant 0 : index
    %67 = vector.load %arg1[%c0_18, %c0_19] : memref<256x128xf32, #tpu.memory_space<vmem>>, vector<256x128xf32>
    %cst_20 = arith.constant 0.000000e+00 : f32
    %68 = vector.broadcast %cst_20 : f32 to vector<1x64xf32>
    %69 = vector.extract_strided_slice %66 {offsets = [0, 64], sizes = [15, 64], strides = [1, 1]} : vector<16x128xf32> to vector<15x64xf32>
    %70 = tpu.concatenate %68, %69 in 0 : vector<1x64xf32>, vector<15x64xf32> -> vector<16x64xf32>
    %71 = vector.broadcast %20 : vector<16x1xf32> to vector<16x64xf32>
    %72 = arith.mulf %70, %71 : vector<16x64xf32>
    %73 = vector.extract_strided_slice %66 {offsets = [1, 0], sizes = [15, 64], strides = [1, 1]} : vector<16x128xf32> to vector<15x64xf32>
    %74 = tpu.concatenate %73, %68 in 0 : vector<15x64xf32>, vector<1x64xf32> -> vector<16x64xf32>
    %75 = vector.broadcast %40 : vector<16x1xf32> to vector<16x64xf32>
    %76 = arith.mulf %74, %75 : vector<16x64xf32>
    %77 = tpu.concatenate %66, %72, %76 in 1 : vector<16x128xf32>, vector<16x64xf32>, vector<16x64xf32> -> vector<16x256xf32>
    %cst_21 = arith.constant dense<0.000000e+00> : vector<16x128xf32>
    %78 = tpu.matmul %77, %67, %cst_21 {dimension_numbers = #tpu.dot_dimension_numbers<[1], [0], [0], [1], [0, 0, 1, 1], [], []>} : vector<16x256xf32>, vector<256x128xf32>, vector<16x128xf32> -> vector<16x128xf32>
    %79 = math.absf %78 : vector<16x128xf32>
    %cst_22 = arith.constant dense<0xFF800000> : vector<128xf32>
    %80 = vector.multi_reduction <maximumf>, %79, %cst_22 [0] : vector<16x128xf32> to vector<128xf32>
    %81 = vector.shape_cast %80 : vector<128xf32> to vector<1x128xf32>
    %cst_23 = arith.constant dense<0xFF800000> : vector<1xf32>
    %82 = vector.multi_reduction <maximumf>, %81, %cst_23 [1] : vector<1x128xf32> to vector<1xf32>
    %83 = vector.shape_cast %82 : vector<1xf32> to vector<1x1xf32>
    %cst_24 = arith.constant 3.05185094E-5 : f32
    %84 = vector.broadcast %cst_24 : f32 to vector<1x1xf32>
    %85 = arith.mulf %83, %84 : vector<1x1xf32>
    %cst_25 = arith.constant 0.000000e+00 : f32
    %86 = vector.broadcast %cst_25 : f32 to vector<1x1xf32>
    %87 = arith.cmpf ogt, %85, %86 : vector<1x1xf32>
    %cst_26 = arith.constant 1.000000e+00 : f32
    %88 = vector.broadcast %cst_26 : f32 to vector<1x1xf32>
    %89 = arith.select %87, %85, %88 : vector<1x1xi1>, vector<1x1xf32>
    %90 = tpu.reciprocal %89 {approx = true} : vector<1x1xf32> -> vector<1x1xf32>
    %91 = arith.mulf %89, %90 : vector<1x1xf32>
    %cst_27 = arith.constant 2.000000e+00 : f32
    %92 = vector.broadcast %cst_27 : f32 to vector<1x1xf32>
    %93 = arith.subf %92, %91 : vector<1x1xf32>
    %94 = arith.mulf %90, %93 : vector<1x1xf32>
    %95 = vector.broadcast %94 : vector<1x1xf32> to vector<16x128xf32>
    %96 = arith.mulf %78, %95 : vector<16x128xf32>
    %97 = math.roundeven %96 : vector<16x128xf32>
    %cst_28 = arith.constant -3.276800e+04 : f32
    %cst_29 = arith.constant 3.276700e+04 : f32
    %98 = vector.broadcast %cst_28 : f32 to vector<16x128xf32>
    %99 = arith.maximumf %98, %97 : vector<16x128xf32>
    %100 = vector.broadcast %cst_29 : f32 to vector<16x128xf32>
    %101 = arith.minimumf %100, %99 : vector<16x128xf32>
    %102 = vector.broadcast %89 : vector<1x1xf32> to vector<16x128xf32>
    %103 = arith.mulf %101, %102 : vector<16x128xf32>
    %c0_30 = arith.constant 0 : index
    %c0_31 = arith.constant 0 : index
    %104 = vector.load %arg7[%c0_30, %c0_31] : memref<128x128xf32, #tpu.memory_space<vmem>>, vector<128x128xf32>
    %c0_32 = arith.constant 0 : index
    %c0_33 = arith.constant 0 : index
    %105 = vector.load %arg3[%c0_32, %c0_33] : memref<1x128xf32, #tpu.memory_space<vmem>>, vector<1x128xf32>
    %c0_34 = arith.constant 0 : index
    %c0_35 = arith.constant 0 : index
    %106 = vector.load %arg4[%c0_34, %c0_35] : memref<1x128xf32, #tpu.memory_space<vmem>>, vector<1x128xf32>
    %cst_36 = arith.constant dense<0.000000e+00> : vector<128xf32>
    %107 = vector.multi_reduction <add>, %103, %cst_36 [0] : vector<16x128xf32> to vector<128xf32>
    %108 = vector.shape_cast %107 : vector<128xf32> to vector<1x128xf32>
    %109 = arith.mulf %103, %103 : vector<16x128xf32>
    %cst_37 = arith.constant dense<0.000000e+00> : vector<128xf32>
    %110 = vector.multi_reduction <add>, %109, %cst_37 [0] : vector<16x128xf32> to vector<128xf32>
    %111 = vector.shape_cast %110 : vector<128xf32> to vector<1x128xf32>
    %112 = tpu.concatenate %108, %111 in 0 : vector<1x128xf32>, vector<1x128xf32> -> vector<2x128xf32>
    %cst_38 = arith.constant dense<0.000000e+00> : vector<2x128xf32>
    %113 = tpu.matmul %112, %104, %cst_38 {dimension_numbers = #tpu.dot_dimension_numbers<[1], [0], [0], [1], [0, 0, 1, 1], [], []>} : vector<2x128xf32>, vector<128x128xf32>, vector<2x128xf32> -> vector<2x128xf32>
    %114 = vector.extract_strided_slice %113 {offsets = [0, 0], sizes = [1, 128], strides = [1, 1]} : vector<2x128xf32> to vector<1x128xf32>
    %115 = vector.extract_strided_slice %113 {offsets = [1, 0], sizes = [1, 128], strides = [1, 1]} : vector<2x128xf32> to vector<1x128xf32>
    %116 = arith.mulf %114, %114 : vector<1x128xf32>
    %117 = arith.subf %115, %116 : vector<1x128xf32>
    %cst_39 = arith.constant 0.000000e+00 : f32
    %118 = vector.broadcast %cst_39 : f32 to vector<1x128xf32>
    %119 = arith.maximumf %117, %118 : vector<1x128xf32>
    %120 = vector.broadcast %114 : vector<1x128xf32> to vector<16x128xf32>
    %121 = arith.subf %103, %120 : vector<16x128xf32>
    %cst_40 = arith.constant 9.99999974E-6 : f32
    %122 = vector.broadcast %cst_40 : f32 to vector<1x128xf32>
    %123 = arith.addf %119, %122 : vector<1x128xf32>
    %124 = math.rsqrt %123 : vector<1x128xf32>
    %125 = vector.broadcast %124 : vector<1x128xf32> to vector<16x128xf32>
    %126 = arith.mulf %121, %125 : vector<16x128xf32>
    %127 = vector.broadcast %105 : vector<1x128xf32> to vector<16x128xf32>
    %128 = arith.mulf %126, %127 : vector<16x128xf32>
    %129 = vector.broadcast %106 : vector<1x128xf32> to vector<16x128xf32>
    %130 = arith.addf %128, %129 : vector<16x128xf32>
    %131 = math.absf %130 : vector<16x128xf32>
    %cst_41 = arith.constant dense<0xFF800000> : vector<128xf32>
    %132 = vector.multi_reduction <maximumf>, %131, %cst_41 [0] : vector<16x128xf32> to vector<128xf32>
    %133 = vector.shape_cast %132 : vector<128xf32> to vector<1x128xf32>
    %cst_42 = arith.constant dense<0xFF800000> : vector<1xf32>
    %134 = vector.multi_reduction <maximumf>, %133, %cst_42 [1] : vector<1x128xf32> to vector<1xf32>
    %135 = vector.shape_cast %134 : vector<1xf32> to vector<1x1xf32>
    %cst_43 = arith.constant 3.05185094E-5 : f32
    %136 = vector.broadcast %cst_43 : f32 to vector<1x1xf32>
    %137 = arith.mulf %135, %136 : vector<1x1xf32>
    %cst_44 = arith.constant 0.000000e+00 : f32
    %138 = vector.broadcast %cst_44 : f32 to vector<1x1xf32>
    %139 = arith.cmpf ogt, %137, %138 : vector<1x1xf32>
    %cst_45 = arith.constant 1.000000e+00 : f32
    %140 = vector.broadcast %cst_45 : f32 to vector<1x1xf32>
    %141 = arith.select %139, %137, %140 : vector<1x1xi1>, vector<1x1xf32>
    %142 = tpu.reciprocal %141 {approx = true} : vector<1x1xf32> -> vector<1x1xf32>
    %143 = arith.mulf %141, %142 : vector<1x1xf32>
    %cst_46 = arith.constant 2.000000e+00 : f32
    %144 = vector.broadcast %cst_46 : f32 to vector<1x1xf32>
    %145 = arith.subf %144, %143 : vector<1x1xf32>
    %146 = arith.mulf %142, %145 : vector<1x1xf32>
    %147 = vector.broadcast %146 : vector<1x1xf32> to vector<16x128xf32>
    %148 = arith.mulf %130, %147 : vector<16x128xf32>
    %149 = math.roundeven %148 : vector<16x128xf32>
    %cst_47 = arith.constant -3.276800e+04 : f32
    %cst_48 = arith.constant 3.276700e+04 : f32
    %150 = vector.broadcast %cst_47 : f32 to vector<16x128xf32>
    %151 = arith.maximumf %150, %149 : vector<16x128xf32>
    %152 = vector.broadcast %cst_48 : f32 to vector<16x128xf32>
    %153 = arith.minimumf %152, %151 : vector<16x128xf32>
    %154 = vector.broadcast %141 : vector<1x1xf32> to vector<16x128xf32>
    %155 = arith.mulf %153, %154 : vector<16x128xf32>
    %cst_49 = arith.constant 0.000000e+00 : f32
    %156 = vector.broadcast %cst_49 : f32 to vector<16x128xf32>
    %157 = arith.maximumf %155, %156 : vector<16x128xf32>
    %c0_50 = arith.constant 0 : index
    %c0_51 = arith.constant 0 : index
    %158 = vector.load %arg2[%c0_50, %c0_51] : memref<256x128xf32, #tpu.memory_space<vmem>>, vector<256x128xf32>
    %cst_52 = arith.constant 0.000000e+00 : f32
    %159 = vector.broadcast %cst_52 : f32 to vector<1x64xf32>
    %160 = vector.extract_strided_slice %157 {offsets = [0, 64], sizes = [15, 64], strides = [1, 1]} : vector<16x128xf32> to vector<15x64xf32>
    %161 = tpu.concatenate %159, %160 in 0 : vector<1x64xf32>, vector<15x64xf32> -> vector<16x64xf32>
    %162 = vector.broadcast %20 : vector<16x1xf32> to vector<16x64xf32>
    %163 = arith.mulf %161, %162 : vector<16x64xf32>
    %164 = vector.extract_strided_slice %157 {offsets = [1, 0], sizes = [15, 64], strides = [1, 1]} : vector<16x128xf32> to vector<15x64xf32>
    %165 = tpu.concatenate %164, %159 in 0 : vector<15x64xf32>, vector<1x64xf32> -> vector<16x64xf32>
    %166 = vector.broadcast %40 : vector<16x1xf32> to vector<16x64xf32>
    %167 = arith.mulf %165, %166 : vector<16x64xf32>
    %168 = tpu.concatenate %157, %163, %167 in 1 : vector<16x128xf32>, vector<16x64xf32>, vector<16x64xf32> -> vector<16x256xf32>
    %cst_53 = arith.constant dense<0.000000e+00> : vector<16x128xf32>
    %169 = tpu.matmul %168, %158, %cst_53 {dimension_numbers = #tpu.dot_dimension_numbers<[1], [0], [0], [1], [0, 0, 1, 1], [], []>} : vector<16x256xf32>, vector<256x128xf32>, vector<16x128xf32> -> vector<16x128xf32>
    %170 = math.absf %169 : vector<16x128xf32>
    %cst_54 = arith.constant dense<0xFF800000> : vector<128xf32>
    %171 = vector.multi_reduction <maximumf>, %170, %cst_54 [0] : vector<16x128xf32> to vector<128xf32>
    %172 = vector.shape_cast %171 : vector<128xf32> to vector<1x128xf32>
    %cst_55 = arith.constant dense<0xFF800000> : vector<1xf32>
    %173 = vector.multi_reduction <maximumf>, %172, %cst_55 [1] : vector<1x128xf32> to vector<1xf32>
    %174 = vector.shape_cast %173 : vector<1xf32> to vector<1x1xf32>
    %cst_56 = arith.constant 3.05185094E-5 : f32
    %175 = vector.broadcast %cst_56 : f32 to vector<1x1xf32>
    %176 = arith.mulf %174, %175 : vector<1x1xf32>
    %cst_57 = arith.constant 0.000000e+00 : f32
    %177 = vector.broadcast %cst_57 : f32 to vector<1x1xf32>
    %178 = arith.cmpf ogt, %176, %177 : vector<1x1xf32>
    %cst_58 = arith.constant 1.000000e+00 : f32
    %179 = vector.broadcast %cst_58 : f32 to vector<1x1xf32>
    %180 = arith.select %178, %176, %179 : vector<1x1xi1>, vector<1x1xf32>
    %181 = tpu.reciprocal %180 {approx = true} : vector<1x1xf32> -> vector<1x1xf32>
    %182 = arith.mulf %180, %181 : vector<1x1xf32>
    %cst_59 = arith.constant 2.000000e+00 : f32
    %183 = vector.broadcast %cst_59 : f32 to vector<1x1xf32>
    %184 = arith.subf %183, %182 : vector<1x1xf32>
    %185 = arith.mulf %181, %184 : vector<1x1xf32>
    %186 = vector.broadcast %185 : vector<1x1xf32> to vector<16x128xf32>
    %187 = arith.mulf %169, %186 : vector<16x128xf32>
    %188 = math.roundeven %187 : vector<16x128xf32>
    %cst_60 = arith.constant -3.276800e+04 : f32
    %cst_61 = arith.constant 3.276700e+04 : f32
    %189 = vector.broadcast %cst_60 : f32 to vector<16x128xf32>
    %190 = arith.maximumf %189, %188 : vector<16x128xf32>
    %191 = vector.broadcast %cst_61 : f32 to vector<16x128xf32>
    %192 = arith.minimumf %191, %190 : vector<16x128xf32>
    %193 = vector.broadcast %180 : vector<1x1xf32> to vector<16x128xf32>
    %194 = arith.mulf %192, %193 : vector<16x128xf32>
    %c0_62 = arith.constant 0 : index
    %c0_63 = arith.constant 0 : index
    %195 = vector.load %arg7[%c0_62, %c0_63] : memref<128x128xf32, #tpu.memory_space<vmem>>, vector<128x128xf32>
    %c0_64 = arith.constant 0 : index
    %c0_65 = arith.constant 0 : index
    %196 = vector.load %arg5[%c0_64, %c0_65] : memref<1x128xf32, #tpu.memory_space<vmem>>, vector<1x128xf32>
    %c0_66 = arith.constant 0 : index
    %c0_67 = arith.constant 0 : index
    %197 = vector.load %arg6[%c0_66, %c0_67] : memref<1x128xf32, #tpu.memory_space<vmem>>, vector<1x128xf32>
    %cst_68 = arith.constant dense<0.000000e+00> : vector<128xf32>
    %198 = vector.multi_reduction <add>, %194, %cst_68 [0] : vector<16x128xf32> to vector<128xf32>
    %199 = vector.shape_cast %198 : vector<128xf32> to vector<1x128xf32>
    %200 = arith.mulf %194, %194 : vector<16x128xf32>
    %cst_69 = arith.constant dense<0.000000e+00> : vector<128xf32>
    %201 = vector.multi_reduction <add>, %200, %cst_69 [0] : vector<16x128xf32> to vector<128xf32>
    %202 = vector.shape_cast %201 : vector<128xf32> to vector<1x128xf32>
    %203 = tpu.concatenate %199, %202 in 0 : vector<1x128xf32>, vector<1x128xf32> -> vector<2x128xf32>
    %cst_70 = arith.constant dense<0.000000e+00> : vector<2x128xf32>
    %204 = tpu.matmul %203, %195, %cst_70 {dimension_numbers = #tpu.dot_dimension_numbers<[1], [0], [0], [1], [0, 0, 1, 1], [], []>} : vector<2x128xf32>, vector<128x128xf32>, vector<2x128xf32> -> vector<2x128xf32>
    %205 = vector.extract_strided_slice %204 {offsets = [0, 0], sizes = [1, 128], strides = [1, 1]} : vector<2x128xf32> to vector<1x128xf32>
    %206 = vector.extract_strided_slice %204 {offsets = [1, 0], sizes = [1, 128], strides = [1, 1]} : vector<2x128xf32> to vector<1x128xf32>
    %207 = arith.mulf %205, %205 : vector<1x128xf32>
    %208 = arith.subf %206, %207 : vector<1x128xf32>
    %cst_71 = arith.constant 0.000000e+00 : f32
    %209 = vector.broadcast %cst_71 : f32 to vector<1x128xf32>
    %210 = arith.maximumf %208, %209 : vector<1x128xf32>
    %211 = vector.broadcast %205 : vector<1x128xf32> to vector<16x128xf32>
    %212 = arith.subf %194, %211 : vector<16x128xf32>
    %cst_72 = arith.constant 9.99999974E-6 : f32
    %213 = vector.broadcast %cst_72 : f32 to vector<1x128xf32>
    %214 = arith.addf %210, %213 : vector<1x128xf32>
    %215 = math.rsqrt %214 : vector<1x128xf32>
    %216 = vector.broadcast %215 : vector<1x128xf32> to vector<16x128xf32>
    %217 = arith.mulf %212, %216 : vector<16x128xf32>
    %218 = vector.broadcast %196 : vector<1x128xf32> to vector<16x128xf32>
    %219 = arith.mulf %217, %218 : vector<16x128xf32>
    %220 = vector.broadcast %197 : vector<1x128xf32> to vector<16x128xf32>
    %221 = arith.addf %219, %220 : vector<16x128xf32>
    %222 = math.absf %221 : vector<16x128xf32>
    %cst_73 = arith.constant dense<0xFF800000> : vector<128xf32>
    %223 = vector.multi_reduction <maximumf>, %222, %cst_73 [0] : vector<16x128xf32> to vector<128xf32>
    %224 = vector.shape_cast %223 : vector<128xf32> to vector<1x128xf32>
    %cst_74 = arith.constant dense<0xFF800000> : vector<1xf32>
    %225 = vector.multi_reduction <maximumf>, %224, %cst_74 [1] : vector<1x128xf32> to vector<1xf32>
    %226 = vector.shape_cast %225 : vector<1xf32> to vector<1x1xf32>
    %cst_75 = arith.constant 3.05185094E-5 : f32
    %227 = vector.broadcast %cst_75 : f32 to vector<1x1xf32>
    %228 = arith.mulf %226, %227 : vector<1x1xf32>
    %cst_76 = arith.constant 0.000000e+00 : f32
    %229 = vector.broadcast %cst_76 : f32 to vector<1x1xf32>
    %230 = arith.cmpf ogt, %228, %229 : vector<1x1xf32>
    %cst_77 = arith.constant 1.000000e+00 : f32
    %231 = vector.broadcast %cst_77 : f32 to vector<1x1xf32>
    %232 = arith.select %230, %228, %231 : vector<1x1xi1>, vector<1x1xf32>
    %233 = tpu.reciprocal %232 {approx = true} : vector<1x1xf32> -> vector<1x1xf32>
    %234 = arith.mulf %232, %233 : vector<1x1xf32>
    %cst_78 = arith.constant 2.000000e+00 : f32
    %235 = vector.broadcast %cst_78 : f32 to vector<1x1xf32>
    %236 = arith.subf %235, %234 : vector<1x1xf32>
    %237 = arith.mulf %233, %236 : vector<1x1xf32>
    %238 = vector.broadcast %237 : vector<1x1xf32> to vector<16x128xf32>
    %239 = arith.mulf %221, %238 : vector<16x128xf32>
    %240 = math.roundeven %239 : vector<16x128xf32>
    %cst_79 = arith.constant -3.276800e+04 : f32
    %cst_80 = arith.constant 3.276700e+04 : f32
    %241 = vector.broadcast %cst_79 : f32 to vector<16x128xf32>
    %242 = arith.maximumf %241, %240 : vector<16x128xf32>
    %243 = vector.broadcast %cst_80 : f32 to vector<16x128xf32>
    %244 = arith.minimumf %243, %242 : vector<16x128xf32>
    %245 = vector.broadcast %232 : vector<1x1xf32> to vector<16x128xf32>
    %246 = arith.mulf %244, %245 : vector<16x128xf32>
    %247 = arith.addf %246, %66 : vector<16x128xf32>
    %cst_81 = arith.constant 0.000000e+00 : f32
    %248 = vector.broadcast %cst_81 : f32 to vector<16x128xf32>
    %249 = arith.maximumf %247, %248 : vector<16x128xf32>
    %c0_82 = arith.constant 0 : index
    %c0_83 = arith.constant 0 : index
    %250 = vector.load %arg8[%c0_82, %c0_83] : memref<16x128xf32, #tpu.memory_space<vmem>>, vector<16x128xf32>
    tpu.vector_store %arg8[%c0_82, %c0_83], %249 {strides = array<i32>} : memref<16x128xf32, #tpu.memory_space<vmem>>, vector<16x128xf32>,
    return
  }
}

</mosaic_0001>

<bundles_post_ra>
// kernel: tile.23
= control target key start
LH: loop header
LB: loop body
LE: loop exit
PB: predicated region body
PF: predicated region fallthrough
CT: control target
= control target key end

     0   :  { %s40_s0 = inlined_call_operand.vmem [shape: f32[4], index: 0, kind: input, shape index: {}]   ;;  %s41_s1 = inlined_call_operand.vmem [shape: f32[32,4], index: 1, kind: output, shape index: {}]  }
   0x1   :  { %v4_v0 = vld [vmem:[%s40_s0] ss:$0 sm:$0xff] }
   0x2   :  { %5 = vst [vmem:[%s41_s1] sm:$0xff] %v4_v0  ;;  %12 = vst [vmem:[%s41_s1 + $0x8] sm:$0xff] %v4_v0 }
   0x3   :  { %13 = vst [vmem:[%s41_s1 + $0x10] sm:$0xff] %v4_v0  ;;  %14 = vst [vmem:[%s41_s1 + $0x18] sm:$0xff] %v4_v0 }

// kernel: tile.24
= control target key start
LH: loop header
LB: loop body
LE: loop exit
PB: predicated region body
PF: predicated region fallthrough
CT: control target
= control target key end

     0   :  { %s259_s10 = smov 124   ;;  %s260_s11 = smov 116   ;;  %vm3_vm0 = vcmask 31744   ;;  %vm9_vm1 = vcmask 1048544   ;;  %vm15_vm2 = vcmask 1015744   ;;  %vm21_vm3 = vcmask 982944   ;;  %s399_s0 = inlined_call_operand.vmem [shape: f32[32,4], index: 0, kind: input, shape index: {}]   ;;  %s400_s1 = inlined_call_operand.vmem [shape: f32[1,128], index: 1, kind: output, shape index: {}]  }
   0x1   :  { %v197_v0 = vld [vmem:[%s399_s0 + $0x1f] sm:$0x1]   ;;  %v199_v1 = vld [vmem:[%s399_s0 + $0x1d] sm:$0x1]   ;;  %v198_v2 = vld [vmem:[%s399_s0 + $0x1e] sm:$0x1]  }
   0x2   :  { %7 = vrot.lane.b32.xlu0 %v197_v0, %s259_s10  ;;  %19 = vrot.lane.b32.xlu1 %v199_v1, %s260_s11  ;;  %v200_v3 = vld [vmem:[%s399_s0 + $0x1c] sm:$0x1]   ;;  %s261_s16 = smov 120   ;;  %s262_s17 = smov 112   ;;  %v201_v4 = vld [vmem:[%s399_s0 + $0x1b] sm:$0x1]  }
   0x3   :  { %v202_v5 = vld [vmem:[%s399_s0 + $0x1a] sm:$0x1]   ;;  %s263_s22 = smov 108   ;;  %s264_s23 = smov 104   ;;  %v203_v6 = vld [vmem:[%s399_s0 + $0x19] sm:$0x1]  }
   0x4   :  { %v204_v7 = vld [vmem:[%s399_s0 + $0x18] sm:$0x1]   ;;  %s265_s28 = smov 100   ;;  %s266_s29 = smov 96   ;;  %v205_v8 = vld [vmem:[%s399_s0 + $0x17] sm:$0x1]  }
   0x5   :  { %v206_v9 = vld [vmem:[%s399_s0 + $0x16] sm:$0x1]   ;;  %v2_v10 = vld [vmem:[%s399_s0] sm:$0x1]   ;;  %s267_s7 = smov 92   ;;  %s268_s8 = smov 88  }
   0x6   :  { %13 = vrot.lane.b32.xlu0 %v198_v2, %s261_s16  ;;  %25 = vrot.lane.b32.xlu1 %v200_v3, %s262_s17  ;;  %4 = vst.msk [vmem:[#allocation0] sm:$0x1] %vm3_vm0, %v2_v10   ;;  %v207_v11 = vld [vmem:[%s399_s0 + $0x15] sm:$0x1]   ;;  %v208_v12 = vld [vmem:[%s399_s0 + $0x14] sm:$0x1]  }
   0x7   :  { %s269_s13 = smov 84   ;;  %s270_s14 = smov 80   ;;  %v209_v13 = vld [vmem:[%s399_s0 + $0x13] sm:$0x1]   ;;  %v210_v14 = vld [vmem:[%s399_s0 + $0x12] sm:$0x1]  }
   0x8   :  { %s271_s19 = smov 76   ;;  %s272_s20 = smov 72   ;;  %v211_v15 = vld [vmem:[%s399_s0 + $0x11] sm:$0x1]   ;;  %v212_v16 = vld [vmem:[%s399_s0 + $0x10] sm:$0x1]  }
   0x9   :  { %s273_s25 = smov 68   ;;  %s274_s26 = smov 64   ;;  %v213_v17 = vld [vmem:[%s399_s0 + $0xf] sm:$0x1]   ;;  %v214_v18 = vld [vmem:[%s399_s0 + $0xe] sm:$0x1]  }
   0xa   :  { %31 = vrot.lane.b32.xlu0 %v201_v4, %s263_s22  ;;  %37 = vrot.lane.b32.xlu1 %v202_v5, %s264_s23  ;;  %s275_s2 = smov 60   ;;  %s276_s3 = smov 56   ;;  %v215_v19 = vld [vmem:[%s399_s0 + $0xd] sm:$0x1]   ;;  %v216_v20 = vld [vmem:[%s399_s0 + $0xc] sm:$0x1]  }
   0xb   :  { %s278_s9 = smov 48   ;;  %v217_v21 = vld [vmem:[%s399_s0 + $0xb] sm:$0x1]   ;;  %v218_v22 = vld [vmem:[%s399_s0 + $0xa] sm:$0x1]   ;;  %s280_s15 = smov 40  }
   0xc   :  { %v219_v23 = vld [vmem:[%s399_s0 + $0x9] sm:$0x1]   ;;  %v220_v24 = vld [vmem:[%s399_s0 + $0x8] sm:$0x1]   ;;  %s282_s21 = smov 32   ;;  %s284_s27 = smov 24  }
   0xd   :  { %v221_v25 = vld [vmem:[%s399_s0 + $0x7] sm:$0x1]   ;;  %v222_v26 = vld [vmem:[%s399_s0 + $0x6] sm:$0x1]   ;;  %v223_v27 = vld [vmem:[%s399_s0 + $0x5] sm:$0x1]  }
   0xe   :  { %43 = vrot.lane.b32.xlu0 %v203_v6, %s265_s28  ;;  %49 = vrot.lane.b32.xlu1 %v204_v7, %s266_s29  ;;  %v224_v28 = vld [vmem:[%s399_s0 + $0x4] sm:$0x1]   ;;  %s286_s4 = smov 16   ;;  %v225_v29 = vld [vmem:[%s399_s0 + $0x3] sm:$0x1]   ;;  %s288_s10 = smov 8  }
   0xf   :  { %v226_v30 = vld [vmem:[%s399_s0 + $0x2] sm:$0x1]   ;;  %v227_v31 = vld [vmem:[%s399_s0 + $0x1] sm:$0x1]   ;;  %s289_s0 = smov 4   ;;  %vm27_vm4 = vcmask 950144  }
  0x10   :  { %vm33_vm5 = vcmask 917344   ;;  %vm39_vm6 = vcmask 884544   ;;  %vm45_vm7 = vcmask 851744   ;;  %vm51_vm8 = vcmask 818944  }
  0x11   :  { %vm57_vm9 = vcmask 786144   ;;  %vm63_vm10 = vcmask 753344   ;;  %vm69_vm11 = vcmask 720544   ;;  %vm75_vm12 = vcmask 687744  }
  0x12   :  { %55 = vrot.lane.b32.xlu0 %v205_v8, %s267_s7  ;;  %61 = vrot.lane.b32.xlu1 %v206_v9, %s268_s8  ;;  %s277_s8 = smov 52   ;;  %vm81_vm13 = vcmask 654944   ;;  %vm87_vm14 = vcmask 622144   ;;  %vm93_vm15 = vcmask 589344   ;;  %vm99_vm0 = vcmask 556544  }
  0x16   :  { %67 = vrot.lane.b32.xlu0 %v207_v11, %s269_s13  ;;  %73 = vrot.lane.b32.xlu1 %v208_v12, %s270_s14  ;;  %s279_s14 = smov 44  }
  0x1a   :  { %79 = vrot.lane.b32.xlu0 %v209_v13, %s271_s19  ;;  %85 = vrot.lane.b32.xlu1 %v210_v14, %s272_s20  ;;  %s281_s20 = smov 36  }
  0x1e   :  { %91 = vrot.lane.b32.xlu0 %v211_v15, %s273_s25  ;;  %97 = vrot.lane.b32.xlu1 %v212_v16, %s274_s26  ;;  %s283_s26 = smov 28  }
  0x22   :  { %103 = vrot.lane.b32.xlu0 %v213_v17, %s275_s2  ;;  %109 = vrot.lane.b32.xlu1 %v214_v18, %s276_s3  ;;  %s285_s3 = smov 20  }
  0x26   :  { %115 = vrot.lane.b32.xlu0 %v215_v19, %s277_s8  ;;  %121 = vrot.lane.b32.xlu1 %v216_v20, %s278_s9  ;;  %s287_s9 = smov 12  }
  0x2a   :  { %127 = vrot.lane.b32.xlu0 %v217_v21, %s279_s14  ;;  %133 = vrot.lane.b32.xlu1 %v218_v22, %s280_s15 }
  0x2e   :  { %139 = vrot.lane.b32.xlu0 %v219_v23, %s281_s20  ;;  %145 = vrot.lane.b32.xlu1 %v220_v24, %s282_s21 }
  0x32   :  { %151 = vrot.lane.b32.xlu0 %v221_v25, %s283_s26  ;;  %157 = vrot.lane.b32.xlu1 %v222_v26, %s284_s27 }
  0x36   :  { %163 = vrot.lane.b32.xlu0 %v223_v27, %s285_s3  ;;  %169 = vrot.lane.b32.xlu1 %v224_v28, %s286_s4 }
  0x3a   :  { %175 = vrot.lane.b32.xlu0 %v225_v29, %s287_s9  ;;  %181 = vrot.lane.b32.xlu1 %v226_v30, %s288_s10 }
  0x3e   :  { %187 = vrot.lane.b32.xlu0 %v227_v31, %s289_s0 }
  0x74   :  { %v8_v32 = vpop.permute.xlu0 %7   ;;  %v20_v33 = vpop.permute.xlu1 %19  }
  0x75   :  { %10 = vst.msk [vmem:[#allocation0] sm:$0x1] %vm9_vm1, %v8_v32   ;;  %vm105_vm1 = vcmask 523744  }
  0x78   :  { %v14_v34 = vpop.permute.xlu0 %13   ;;  %v26_v35 = vpop.permute.xlu1 %25  }
  0x79   :  { %16 = vst.msk [vmem:[#allocation0] sm:$0x1] %vm15_vm2, %v14_v34   ;;  %vm111_vm2 = vcmask 490944  }
  0x7a   :  { %22 = vst.msk [vmem:[#allocation0] sm:$0x1] %vm21_vm3, %v20_v33   ;;  %vm117_vm3 = vcmask 458144  }
  0x7b   :  { %28 = vst.msk [vmem:[#allocation0] sm:$0x1] %vm27_vm4, %v26_v35   ;;  %vm123_vm4 = vcmask 425344  }
  0x7c   :  { %v32_v36 = vpop.permute.xlu0 %31   ;;  %v38_v37 = vpop.permute.xlu1 %37  }
  0x7d   :  { %34 = vst.msk [vmem:[#allocation0] sm:$0x1] %vm33_vm5, %v32_v36   ;;  %vm129_vm5 = vcmask 392544  }
  0x7e   :  { %40 = vst.msk [vmem:[#allocation0] sm:$0x1] %vm39_vm6, %v38_v37   ;;  %vm135_vm6 = vcmask 359744  }
  0x80   :  { %v44_v38 = vpop.permute.xlu0 %43   ;;  %v50_v39 = vpop.permute.xlu1 %49  }
  0x81   :  { %46 = vst.msk [vmem:[#allocation0] sm:$0x1] %vm45_vm7, %v44_v38   ;;  %vm141_vm7 = vcmask 326944  }
  0x82   :  { %52 = vst.msk [vmem:[#allocation0] sm:$0x1] %vm51_vm8, %v50_v39   ;;  %vm147_vm8 = vcmask 294144  }
  0x84   :  { %v56_v40 = vpop.permute.xlu0 %55   ;;  %v62_v41 = vpop.permute.xlu1 %61  }
  0x85   :  { %58 = vst.msk [vmem:[#allocation0] sm:$0x1] %vm57_vm9, %v56_v40   ;;  %vm153_vm9 = vcmask 261344  }
  0x86   :  { %64 = vst.msk [vmem:[#allocation0] sm:$0x1] %vm63_vm10, %v62_v41   ;;  %vm159_vm10 = vcmask 228544  }
  0x88   :  { %v68_v42 = vpop.permute.xlu0 %67   ;;  %v74_v43 = vpop.permute.xlu1 %73  }
  0x89   :  { %70 = vst.msk [vmem:[#allocation0] sm:$0x1] %vm69_vm11, %v68_v42   ;;  %vm165_vm11 = vcmask 195744  }
  0x8a   :  { %76 = vst.msk [vmem:[#allocation0] sm:$0x1] %vm75_vm12, %v74_v43   ;;  %vm171_vm12 = vcmask 162944  }
  0x8c   :  { %v80_v44 = vpop.permute.xlu0 %79   ;;  %v86_v45 = vpop.permute.xlu1 %85  }
  0x8d   :  { %82 = vst.msk [vmem:[#allocation0] sm:$0x1] %vm81_vm13, %v80_v44   ;;  %vm177_vm13 = vcmask 130144  }
  0x8e   :  { %88 = vst.msk [vmem:[#allocation0] sm:$0x1] %vm87_vm14, %v86_v45   ;;  %vm183_vm14 = vcmask 97344  }
  0x90   :  { %v92_v46 = vpop.permute.xlu0 %91   ;;  %v98_v47 = vpop.permute.xlu1 %97  }
  0x91   :  { %94 = vst.msk [vmem:[#allocation0] sm:$0x1] %vm93_vm15, %v92_v46   ;;  %vm189_vm15 = vcmask 64544  }
  0x92   :  { %100 = vst.msk [vmem:[#allocation0] sm:$0x1] %vm99_vm0, %v98_v47  }
  0x94   :  { %v104_v48 = vpop.permute.xlu0 %103   ;;  %v110_v49 = vpop.permute.xlu1 %109  }
  0x95   :  { %106 = vst.msk [vmem:[#allocation0] sm:$0x1] %vm105_vm1, %v104_v48  }
  0x96   :  { %112 = vst.msk [vmem:[#allocation0] sm:$0x1] %vm111_vm2, %v110_v49  }
  0x98   :  { %v116_v50 = vpop.permute.xlu0 %115   ;;  %v122_v51 = vpop.permute.xlu1 %121  }
  0x99   :  { %118 = vst.msk [vmem:[#allocation0] sm:$0x1] %vm117_vm3, %v116_v50  }
  0x9a   :  { %124 = vst.msk [vmem:[#allocation0] sm:$0x1] %vm123_vm4, %v122_v51  }
  0x9c   :  { %v128_v52 = vpop.permute.xlu0 %127   ;;  %v134_v53 = vpop.permute.xlu1 %133  }
  0x9d   :  { %130 = vst.msk [vmem:[#allocation0] sm:$0x1] %vm129_vm5, %v128_v52  }
  0x9e   :  { %136 = vst.msk [vmem:[#allocation0] sm:$0x1] %vm135_vm6, %v134_v53  }
  0xa0   :  { %v140_v54 = vpop.permute.xlu0 %139   ;;  %v146_v55 = vpop.permute.xlu1 %145  }
  0xa1   :  { %142 = vst.msk [vmem:[#allocation0] sm:$0x1] %vm141_vm7, %v140_v54  }
  0xa2   :  { %148 = vst.msk [vmem:[#allocation0] sm:$0x1] %vm147_vm8, %v146_v55  }
  0xa4   :  { %v152_v56 = vpop.permute.xlu0 %151   ;;  %v158_v57 = vpop.permute.xlu1 %157  }
  0xa5   :  { %154 = vst.msk [vmem:[#allocation0] sm:$0x1] %vm153_vm9, %v152_v56  }
  0xa6   :  { %160 = vst.msk [vmem:[#allocation0] sm:$0x1] %vm159_vm10, %v158_v57  }
  0xa8   :  { %v164_v58 = vpop.permute.xlu0 %163   ;;  %v170_v59 = vpop.permute.xlu1 %169  }
  0xa9   :  { %166 = vst.msk [vmem:[#allocation0] sm:$0x1] %vm165_vm11, %v164_v58  }
  0xaa   :  { %172 = vst.msk [vmem:[#allocation0] sm:$0x1] %vm171_vm12, %v170_v59  }
  0xac   :  { %v176_v60 = vpop.permute.xlu0 %175   ;;  %v182_v61 = vpop.permute.xlu1 %181  }
  0xad   :  { %178 = vst.msk [vmem:[#allocation0] sm:$0x1] %vm177_vm13, %v176_v60  }
  0xae   :  { %184 = vst.msk [vmem:[#allocation0] sm:$0x1] %vm183_vm14, %v182_v61  }
  0xb0   :  { %v188_v62 = vpop.permute.xlu0 %187  }
  0xb1   :  { %190 = vst.msk [vmem:[#allocation0] sm:$0x1] %vm189_vm15, %v188_v62  }
  0xb8   :  { %v194_v63 = vld [vmem:[#allocation0] sm:$0x1] }
  0xb9   :  { %196 = vst [vmem:[%s400_s1] sm:$0x1] %v194_v63 }

// kernel: basic_block_forward.1
= control target key start
LH: loop header
LB: loop body
LE: loop exit
PB: predicated region body
PF: predicated region fallthrough
CT: control target
= control target key end

     0   :  { %v29_v56 = vlaneseq  ;;  %vm132_vm1 = vcmask 1040384   ;;  %vm145_vm3 = vcmask 1046528   ;;  %vm162_vm7 = vcmask 523264   ;;  %s1542_s0 = inlined_call_operand.vmem [shape: f32[16,128], index: 0, kind: input, shape index: {}]   ;;  %s1543_s1 = inlined_call_operand.vmem [shape: f32[256,128], index: 1, kind: input, shape index: {}]   ;;  %s1544_s7 = inlined_call_operand.vmem [shape: f32[128,128], index: 7, kind: input, shape index: {}]   ;;  %s1545_s3 = inlined_call_operand.vmem [shape: f32[1,128], index: 3, kind: input, shape index: {}]   ;;  %s1546_s4 = inlined_call_operand.vmem [shape: f32[1,128], index: 4, kind: input, shape index: {}]   ;;  %s1547_s2 = inlined_call_operand.vmem [shape: f32[256,128], index: 2, kind: input, shape index: {}]   ;;  %s1548_s5 = inlined_call_operand.vmem [shape: f32[1,128], index: 5, kind: input, shape index: {}]   ;;  %s1549_s6 = inlined_call_operand.vmem [shape: f32[1,128], index: 6, kind: input, shape index: {}]   ;;  %s1550_s8 = inlined_call_operand.vmem [shape: f32[16,128], index: 8, kind: output, shape index: {}]  }
   0x1   :  { %v1149_v0 = vld [vmem:[%s1542_s0] sm:$0xff]  ;;  %v1154_v1 = vld [vmem:[%s1542_s0 + $0x8] sm:$0xff]  ;;  %v116_v16 = vld [vmem:[%s1543_s1 + $0x90] sm:$0xff]  ;;  %vm1100_vm8 = vmmov 0  }
   0x2   :  { %v70_v2 = vand.u32 2147483647, %v1149_v0  ;;  %v71_v3 = vand.u32 2147483647, %v1154_v1  ;;  %v114_v11 = vld [vmem:[%s1543_s1 + $0x80] sm:$0xff]  ;;  %v115_v12 = vld [vmem:[%s1543_s1 + $0x88] sm:$0xff] }
   0x3   :  { %v98_v13 = vld [vmem:[%s1543_s1] sm:$0xff]  ;;  %v957_v14 = vpack.c.bf16 %v115_v12, %v114_v11  ;;  %v99_v15 = vld [vmem:[%s1543_s1 + $0x8] sm:$0xff]  ;;  %v117_v17 = vld [vmem:[%s1543_s1 + $0x98] sm:$0xff] }
   0x4   :  { %v72_v4 = vmax.f32.f32 %v70_v2, %v71_v3  ;;  %v959_v18 = vpack.c.bf16 %v99_v15, %v98_v13  ;;  %v961_v19 = vpack.c.bf16 %v117_v17, %v116_v16  ;;  %v100_v20 = vld [vmem:[%s1543_s1 + $0x10] sm:$0xff]  ;;  %v101_v21 = vld [vmem:[%s1543_s1 + $0x18] sm:$0xff]  ;;  %v118_v22 = vld [vmem:[%s1543_s1 + $0xa0] sm:$0xff]  ;;  %v1250_v3 = vshrl.u32 %v29_v56, 7 }
   0x5   :  { %958 = vmatprep.subr.bf16.mxu0 %v957_v14  ;;  %v119_v23 = vld [vmem:[%s1543_s1 + $0xa8] sm:$0xff]  ;;  %v963_v24 = vpack.c.bf16 %v101_v21, %v100_v20  ;;  %v102_v26 = vld [vmem:[%s1543_s1 + $0x20] sm:$0xff]  ;;  %v120_v28 = vld [vmem:[%s1543_s1 + $0xb0] sm:$0xff] }
   0x6   :  { %v73_v5 = vrot.slane %v72_v4, 4  ;;  %960 = vmatpush3.bf16.msra.mxu0 %v959_v18  ;;  %v965_v25 = vpack.c.bf16 %v119_v23, %v118_v22  ;;  %v103_v27 = vld [vmem:[%s1543_s1 + $0x28] sm:$0xff]  ;;  %v121_v29 = vld [vmem:[%s1543_s1 + $0xb8] sm:$0xff]  ;;  %v104_v32 = vld [vmem:[%s1543_s1 + $0x30] sm:$0xff]  ;;  %v36_v11 = vand.u32 7, %v1250_v3  ;;  %v1098_v22 = vmov 0.0  }
   0x7   :  { %962 = vmatprep.subr.bf16.mxu0 %v961_v19  ;;  %v967_v30 = vpack.c.bf16 %v103_v27, %v102_v26  ;;  %v969_v31 = vpack.c.bf16 %v121_v29, %v120_v28  ;;  %v105_v33 = vld [vmem:[%s1543_s1 + $0x38] sm:$0xff]  ;;  %v122_v34 = vld [vmem:[%s1543_s1 + $0xc0] sm:$0xff]  ;;  %v123_v35 = vld [vmem:[%s1543_s1 + $0xc8] sm:$0xff]  ;;  %919 = vmatprep.mubr.msk.f32.mxu1 %vm1100_vm8, %v1098_v22 }
   0x8   :  { %v74_v6 = vmax.f32 %v72_v4, %v73_v5  ;;  %v971_v36 = vpack.c.bf16 %v105_v33, %v104_v32  ;;  %v973_v37 = vpack.c.bf16 %v123_v35, %v122_v34  ;;  %v106_v38 = vld [vmem:[%s1543_s1 + $0x40] sm:$0xff]  ;;  %v107_v39 = vld [vmem:[%s1543_s1 + $0x48] sm:$0xff]  ;;  %v124_v40 = vld [vmem:[%s1543_s1 + $0xd0] sm:$0xff]  ;;  %vm62_vm2 = vcmp.ne.s32.totalorder %v36_v11, 7 }
   0x9   :  { %v125_v41 = vld [vmem:[%s1543_s1 + $0xd8] sm:$0xff]  ;;  %v975_v42 = vpack.c.bf16 %v107_v39, %v106_v38  ;;  %v108_v44 = vld [vmem:[%s1543_s1 + $0x50] sm:$0xff]  ;;  %v126_v46 = vld [vmem:[%s1543_s1 + $0xe0] sm:$0xff]  ;;  %v1271_v23 = vsel %vm62_vm2, 1.0, %v1098_v22  ;;  %vm56_vm5 = vcmp.ne.s32.totalorder %v36_v11, 0 }
   0xa   :  { %v75_v7 = vrot.slane %v74_v6, 2  ;;  %964 = vmatpush3.bf16.msra.mxu0 %v963_v24  ;;  %v977_v43 = vpack.c.bf16 %v125_v41, %v124_v40  ;;  %v109_v45 = vld [vmem:[%s1543_s1 + $0x58] sm:$0xff]  ;;  %v127_v47 = vld [vmem:[%s1543_s1 + $0xe8] sm:$0xff]  ;;  %v110_v57 = vld [vmem:[%s1543_s1 + $0x60] sm:$0xff] }
   0xb   :  { %966 = vmatprep.subr.bf16.mxu0 %v965_v25  ;;  %v979_v48 = vpack.c.bf16 %v109_v45, %v108_v44  ;;  %v981_v49 = vpack.c.bf16 %v127_v47, %v126_v46  ;;  %v111_v58 = vld [vmem:[%s1543_s1 + $0x68] sm:$0xff]  ;;  %v128_v61 = vld [vmem:[%s1543_s1 + $0xf0] sm:$0xff]  ;;  %v129_v62 = vld [vmem:[%s1543_s1 + $0xf8] sm:$0xff] }
   0xc   :  { %v76_v8 = vmax.f32 %v74_v6, %v75_v7  ;;  %v983_v59 = vpack.c.bf16 %v111_v58, %v110_v57  ;;  %v985_v4 = vpack.c.bf16 %v129_v62, %v128_v61  ;;  %v112_v5 = vld [vmem:[%s1543_s1 + $0x70] sm:$0xff]  ;;  %v113_v6 = vld [vmem:[%s1543_s1 + $0x78] sm:$0xff]  ;;  %s1097_s1 = smov 64   ;;  %v269_v56 = vld [vmem:[%s1544_s7 + $0x8] sm:$0xff]  ;;  %v1099_v58 = vmov 0.0|0.0  }
   0xd   :  { %v987_v7 = vpack.c.bf16 %v113_v6, %v112_v5  ;;  %989 = vmatprep.subr.bf16.mxu1 %v1099_v58  ;;  %v272_v62 = vld [vmem:[%s1544_s7 + $0x20] sm:$0xff]  ;;  %v275_v5 = vld [vmem:[%s1544_s7 + $0x38] sm:$0xff] }
   0xe   :  { %v77_v9 = vrot.slane %v76_v8, 1  ;;  %968 = vmatpush3.bf16.msra.mxu0 %v967_v30  ;;  %v1284_v30 = vsel %vm56_vm5, 1.0, %v1098_v22  ;;  %v280_v11 = vld [vmem:[%s1544_s7 + $0x60] sm:$0xff] }
   0xf   :  { %970 = vmatprep.subr.bf16.mxu0 %v969_v31 }
  0x10   :  { %v78_v10 = vmax.f32 %v76_v8, %v77_v9 }
  0x12   :  { %79 = vmax.xlane.f32.xlu0 %v78_v10  ;;  %972 = vmatpush3.bf16.msra.mxu0 %v971_v36 }
  0x13   :  { %974 = vmatprep.subr.bf16.mxu0 %v973_v37 }
  0x16   :  { %976 = vmatpush3.bf16.msra.mxu0 %v975_v42 }
  0x17   :  { %978 = vmatprep.subr.bf16.mxu0 %v977_v43 }
  0x1a   :  { %980 = vmatpush3.bf16.msra.mxu0 %v979_v48 }
  0x1b   :  { %982 = vmatprep.subr.bf16.mxu0 %v981_v49 }
  0x1e   :  { %984 = vmatpush3.bf16.msra.mxu0 %v983_v59  ;;  %v270_v59 = vld [vmem:[%s1544_s7 + $0x10] sm:$0xff] }
  0x1f   :  { %986 = vmatprep.subr.bf16.mxu0 %v985_v4  ;;  %v274_v4 = vld [vmem:[%s1544_s7 + $0x30] sm:$0xff] }
  0x20   :  { %v1339_v6 = vpack.c.bf16 %v275_v5, %v274_v4  ;;  %v381_v4 = vsub.s32 0, %v1250_v3 }
  0x22   :  { %988 = vmatpush3.bf16.msra.mxu0 %v987_v7  ;;  %v276_v7 = vld [vmem:[%s1544_s7 + $0x40] sm:$0xff] }
  0x9f   :  { %v80_v50 = vpop.xlane.xlu0 %79 }
  0xa0   :  { %v81_v51 = vmul.f32 3.051851e-05, %v80_v50 }
  0xa2   :  { %vm82_vm0 = vcmp.gt.f32.partialorder %v81_v51, 0.0 }
  0xa3   :  { %v83_v52 = vsel %vm82_vm0, %v81_v51, 1.0 }
  0xa4   :  { %1083 = vrcp.f32 %v83_v52 }
  0xae   :  { %v1084_v53 = vpop.eup %1083 }
  0xaf   :  { %v85_v54 = vmul.f32 %v1084_v53, %v83_v52 }
  0xb1   :  { %v86_v55 = vsub.f32 2.0, %v85_v54 }
  0xb3   :  { %v87_v60 = vmul.f32 %v1084_v53, %v86_v55  ;;  %v268_v55 = vld [vmem:[%s1544_s7] sm:$0xff] }
  0xb4   :  { %v1308_v57 = vpack.c.bf16 %v269_v56, %v268_v55 }
  0xb5   :  { %v88_v63 = vmul.f32 %v87_v60, %v1149_v0  ;;  %v89_v2 = vmul.f32 %v87_v60, %v1154_v1  ;;  %v31_v1 = vadd.s32 8, %v1250_v3  ;;  %v271_v60 = vld [vmem:[%s1544_s7 + $0x18] sm:$0xff] }
  0xb6   :  { %991 = vmatpush3.bf16.msra.mxu1 %v1308_v57  ;;  %v1319_v61 = vpack.c.bf16 %v271_v60, %v270_v59 }
  0xb7   :  { %v1069_v8 = vround.rtne.f32 %v88_v63  ;;  %v1070_v9 = vround.rtne.f32 %v89_v2  ;;  %v43_v16 = vand.u32 7, %v31_v1  ;;  %992 = vmatprep.subr.bf16.mxu1 %v1099_v58  ;;  %v273_v63 = vld [vmem:[%s1544_s7 + $0x28] sm:$0xff] }
  0xb8   :  { %v1329_v2 = vpack.c.bf16 %v273_v63, %v272_v62 }
  0xb9   :  { %v92_v10 = vmax.f32 %v1069_v8, -32768.0  ;;  %v93_v0 = vmax.f32 %v1070_v9, -32768.0  ;;  %vm63_vm4 = vcmp.ne.s32.totalorder %v43_v16, 7  ;;  %vm57_vm6 = vcmp.ne.s32.totalorder %v43_v16, 0  ;;  %v277_v8 = vld [vmem:[%s1544_s7 + $0x48] sm:$0xff]  ;;  %v282_v16 = vld [vmem:[%s1544_s7 + $0x70] sm:$0xff] }
  0xba   :  { %v1277_v26 = vsel %vm63_vm4, 1.0, %v1098_v22  ;;  %v1289_v34 = vsel %vm57_vm6, 1.0, %v1098_v22  ;;  %994 = vmatpush3.bf16.msra.mxu1 %v1319_v61  ;;  %v1349_v9 = vpack.c.bf16 %v277_v8, %v276_v7 }
  0xbb   :  { %v94_v12 = vmin.f32 %v92_v10, 32767.0  ;;  %v95_v13 = vmin.f32 %v93_v0, 32767.0  ;;  %995 = vmatprep.subr.bf16.mxu1 %v1099_v58  ;;  %v278_v10 = vld [vmem:[%s1544_s7 + $0x50] sm:$0xff]  ;;  %v279_v0 = vld [vmem:[%s1544_s7 + $0x58] sm:$0xff] }
  0xbc   :  { %v1005_v1 = vpack.c.bf16 %v279_v0, %v278_v10  ;;  %v773_v10 = vld [vmem:[%s1545_s3] ss:$0 sm:$0xff] }
  0xbd   :  { %v1260_v14 = vmul.f32 %v94_v12, %v83_v52  ;;  %v1262_v15 = vmul.f32 %v95_v13, %v83_v52  ;;  %v281_v12 = vld [vmem:[%s1544_s7 + $0x68] sm:$0xff] }
  0xbe   :  { %997 = vmatpush3.bf16.msra.mxu1 %v1329_v2  ;;  %v1008_v13 = vpack.c.bf16 %v281_v12, %v280_v11  ;;  %v774_v11 = vld [vmem:[%s1546_s4] ss:$0 sm:$0xff] }
  0xbf   :  { %v133_v17 = vrot.slane %v1260_v14, 7  ;;  %v134_v18 = vrot.slane %v1262_v15, 7  ;;  %v146_v19 = vrot.slane %v1260_v14, 1  ;;  %v147_v20 = vrot.slane %v1262_v15, 1  ;;  %998 = vmatprep.subr.bf16.mxu1 %v1099_v58 }
  0xc1   :  { %136 = vrot.lane.b32.xlu0 %v133_v17, %s1097_s1  ;;  %v135_v21 = vsel %vm132_vm1, %v133_v17, %v134_v18  ;;  %v148_v24 = vsel %vm145_vm3, %v146_v19, %v147_v20  ;;  %v151_v27 = vsel %vm145_vm3, %v147_v20, 0.0  ;;  %v283_v17 = vld [vmem:[%s1544_s7 + $0x78] sm:$0xff] }
  0xc2   :  { %138 = vrot.lane.b32.xlu1 %v135_v21, %s1097_s1  ;;  %v152_v25 = vmul.f32 %v1271_v23, %v148_v24  ;;  %v153_v28 = vmul.f32 %v1277_v26, %v151_v27  ;;  %1000 = vmatpush3.bf16.msra.mxu1 %v1339_v6  ;;  %v1011_v18 = vpack.c.bf16 %v283_v17, %v282_v16 }
  0xc3   :  { %1001 = vmatprep.subr.bf16.mxu1 %v1099_v58 }
  0xc6   :  { %156 = vrot.lane.b32.xlu1 %v152_v25, %s1097_s1  ;;  %1003 = vmatpush3.bf16.msra.mxu1 %v1349_v9 }
  0xc7   :  { %1004 = vmatprep.subr.bf16.mxu1 %v1099_v58 }
  0xca   :  { %158 = vrot.lane.b32.xlu1 %v153_v28, %s1097_s1  ;;  %1006 = vmatpush3.bf16.msra.mxu1 %v1005_v1 }
  0xcb   :  { %1007 = vmatprep.subr.bf16.mxu1 %v1099_v58 }
  0xce   :  { %1009 = vmatpush3.bf16.msra.mxu1 %v1008_v13 }
  0xcf   :  { %1010 = vmatprep.subr.bf16.mxu1 %v1099_v58 }
  0xd2   :  { %1012 = vmatpush3.bf16.msra.mxu1 %v1011_v18 }
  0xd3   :  { %1045 = vmatprep.subr.bf16.mxu1 %v1099_v58 }
 0x133   :  { %v137_v29 = vpop.permute.xlu0 %136 }
 0x134   :  { %v142_v31 = vsel %vm132_vm1, 0.0, %v137_v29  ;;  %v139_v32 = vpop.permute.xlu1 %138 }
 0x135   :  { %v143_v33 = vmul.f32 %v1284_v30, %v142_v31  ;;  %v144_v37 = vmul.f32 %v1289_v34, %v139_v32 }
 0x138   :  { %v157_v35 = vpop.permute.xlu1 %156 }
 0x139   :  { %v163_v36 = vsel %vm162_vm7, %v143_v33, %v157_v35 }
 0x13a   :  { %229 = vmatprep.mubr.f32.mxu0 %v163_v36 }
 0x13b   :  { %230 = vmatmul.mubr.f32.vlgmr.msra.gmra.mrb[0].mxu0 %v1260_v14 }
 0x13c   :  { %v159_v38 = vpop.permute.xlu1 %158 }
 0x13d   :  { %v164_v39 = vsel %vm162_vm7, %v144_v37, %v159_v38 }
 0x13e   :  { %234 = vmatprep.mubr.f32.mxu0 %v164_v39 }
 0x13f   :  { %235 = vmatmul.mubr.f32.gmra.mrb[2].mxu0 %v1262_v15 }
 0x20e   :  { %v809_v40 = vpop.f32.mrb[0].mxu0 }
 0x20f   :  { %v810_v41 = vpop.f32.mrb[1].mxu0 }
 0x210   :  { %v1296_v42 = vadd.f32 %v810_v41, %v809_v40 }
 0x212   :  { %v812_v43 = vpop.f32.mrb[2].mxu0  ;;  %v240_v46 = vand.u32 2147483647, %v1296_v42 }
 0x213   :  { %v813_v44 = vpop.f32.mrb[3].mxu0 }
 0x214   :  { %v1298_v45 = vadd.f32 %v813_v44, %v812_v43 }
 0x216   :  { %v241_v47 = vand.u32 2147483647, %v1298_v45 }
 0x218   :  { %v242_v48 = vmax.f32.f32 %v240_v46, %v241_v47 }
 0x21a   :  { %v243_v49 = vrot.slane %v242_v48, 4 }
 0x21c   :  { %v244_v50 = vmax.f32 %v242_v48, %v243_v49 }
 0x21e   :  { %v245_v51 = vrot.slane %v244_v50, 2 }
 0x220   :  { %v246_v52 = vmax.f32 %v244_v50, %v245_v51 }
 0x222   :  { %v247_v53 = vrot.slane %v246_v52, 1 }
 0x224   :  { %v248_v54 = vmax.f32 %v246_v52, %v247_v53 }
 0x226   :  { %249 = vmax.xlane.f32.xlu1 %v248_v54 }
 0x2b3   :  { %v250_v19 = vpop.xlane.xlu1 %249 }
 0x2b4   :  { %v251_v20 = vmul.f32 3.051851e-05, %v250_v19 }
 0x2b6   :  { %vm252_vm9 = vcmp.gt.f32.partialorder %v251_v20, 0.0 }
 0x2b7   :  { %v253_v21 = vsel %vm252_vm9, %v251_v20, 1.0 }
 0x2b8   :  { %1085 = vrcp.f32 %v253_v21 }
 0x2c2   :  { %v1086_v24 = vpop.eup %1085 }
 0x2c3   :  { %v255_v25 = vmul.f32 %v1086_v24, %v253_v21 }
 0x2c5   :  { %v256_v27 = vsub.f32 2.0, %v255_v25 }
 0x2c7   :  { %v257_v28 = vmul.f32 %v1086_v24, %v256_v27 }
 0x2c9   :  { %v258_v29 = vmul.f32 %v1296_v42, %v257_v28  ;;  %v259_v31 = vmul.f32 %v1298_v45, %v257_v28 }
 0x2cb   :  { %v1071_v32 = vround.rtne.f32 %v258_v29  ;;  %v1072_v33 = vround.rtne.f32 %v259_v31  ;;  %v455_v31 = vld [vmem:[%s1547_s2 + $0x80] sm:$0xff] }
 0x2cd   :  { %v262_v35 = vmax.f32 %v1071_v32, -32768.0  ;;  %v263_v36 = vmax.f32 %v1072_v33, -32768.0  ;;  %v456_v32 = vld [vmem:[%s1547_s2 + $0x88] sm:$0xff]  ;;  %v439_v33 = vld [vmem:[%s1547_s2] sm:$0xff] }
 0x2cf   :  { %v264_v37 = vmin.f32 %v262_v35, 32767.0  ;;  %v265_v38 = vmin.f32 %v263_v36, 32767.0  ;;  %v1013_v35 = vpack.c.bf16 %v456_v32, %v455_v31  ;;  %v440_v36 = vld [vmem:[%s1547_s2 + $0x8] sm:$0xff]  ;;  %v453_v32 = vld [vmem:[%s1547_s2 + $0x70] sm:$0xff] }
 0x2d1   :  { %v266_v39 = vmul.f32 %v264_v37, %v253_v21  ;;  %v267_v40 = vmul.f32 %v265_v38, %v253_v21  ;;  %v457_v37 = vld [vmem:[%s1547_s2 + $0x90] sm:$0xff]  ;;  %v458_v38 = vld [vmem:[%s1547_s2 + $0x98] sm:$0xff]  ;;  %1014 = vmatprep.subr.bf16.mxu0 %v1013_v35 }
 0x2d3   :  { %v286_v41 = vadd.f32 %v267_v40, %v266_v39  ;;  %v293_v43 = vmul.f32 %v266_v39, %v266_v39  ;;  %v294_v44 = vmul.f32 %v267_v40, %v267_v40 }
 0x2d5   :  { %v287_v46 = vrot.slane %v286_v41, 4  ;;  %v295_v47 = vadd.f32 %v294_v44, %v293_v43  ;;  %v442_v43 = vld [vmem:[%s1547_s2 + $0x18] sm:$0xff]  ;;  %v459_v44 = vld [vmem:[%s1547_s2 + $0xa0] sm:$0xff] }
 0x2d7   :  { %v288_v48 = vadd.f32 %v287_v46, %v286_v41  ;;  %v296_v49 = vrot.slane %v295_v47, 4  ;;  %v441_v41 = vld [vmem:[%s1547_s2 + $0x10] sm:$0xff]  ;;  %v460_v46 = vld [vmem:[%s1547_s2 + $0xa8] sm:$0xff] }
 0x2d9   :  { %v289_v50 = vrot.slane %v288_v48, 2  ;;  %v297_v51 = vadd.f32 %v296_v49, %v295_v47  ;;  %v1019_v47 = vpack.c.bf16 %v442_v43, %v441_v41  ;;  %v443_v49 = vld [vmem:[%s1547_s2 + $0x20] sm:$0xff] }
 0x2db   :  { %v290_v42 = vadd.f32 %v289_v50, %v288_v48  ;;  %v298_v52 = vrot.slane %v297_v51, 2  ;;  %v1021_v48 = vpack.c.bf16 %v460_v46, %v459_v44  ;;  %v444_v50 = vld [vmem:[%s1547_s2 + $0x28] sm:$0xff] }
 0x2dd   :  { %v291_v45 = vrot.slane %v290_v42, 1  ;;  %v299_v53 = vadd.f32 %v298_v52, %v297_v51  ;;  %v461_v51 = vld [vmem:[%s1547_s2 + $0xb0] sm:$0xff]  ;;  %v1023_v52 = vpack.c.bf16 %v444_v50, %v443_v49 }
 0x2df   :  { %v300_v54 = vrot.slane %v299_v53, 1  ;;  %v292_v55 = vadd.f32 %v291_v45, %v290_v42  ;;  %v462_v42 = vld [vmem:[%s1547_s2 + $0xb8] sm:$0xff] }
 0x2e0   :  { %v1025_v45 = vpack.c.bf16 %v462_v42, %v461_v51 }
 0x2e1   :  { %v301_v56 = vadd.f32 %v300_v54, %v299_v53  ;;  %v445_v53 = vld [vmem:[%s1547_s2 + $0x30] sm:$0xff]  ;;  %v446_v54 = vld [vmem:[%s1547_s2 + $0x38] sm:$0xff] }
 0x2e3   :  { %v302_v59 = vsel %vm132_vm1, %v292_v55, %v301_v56  ;;  %v463_v55 = vld [vmem:[%s1547_s2 + $0xc0] sm:$0xff]  ;;  %v464_v56 = vld [vmem:[%s1547_s2 + $0xc8] sm:$0xff] }
 0x2e4   :  { %920 = vmatmul.mubr.f32.vlgmr.msra.gmra.mrb[0].mxu1 %v302_v59  ;;  %v1027_v59 = vpack.c.bf16 %v446_v54, %v445_v53 }
 0x2e5   :  { %1047 = vmatpush3.bf16.msra.mxu1 %v1308_v57  ;;  %954 = vmatprep.mubr.msk.f32.mxu1 %vm1100_vm8, %v1098_v22 }
 0x2e6   :  { %1048 = vmatprep.subr.bf16.mxu1 %v1099_v58 }
 0x2e9   :  { %1050 = vmatpush3.bf16.msra.mxu1 %v1319_v61 }
 0x2ea   :  { %1051 = vmatprep.subr.bf16.mxu1 %v1099_v58 }
 0x2ed   :  { %1053 = vmatpush3.bf16.msra.mxu1 %v1329_v2 }
 0x2ee   :  { %1054 = vmatprep.subr.bf16.mxu1 %v1099_v58 }
 0x2f1   :  { %1056 = vmatpush3.bf16.msra.mxu1 %v1339_v6  ;;  %v389_v6 = vsub.s32 1, %v1250_v3 }
 0x2f2   :  { %1057 = vmatprep.subr.bf16.mxu1 %v1099_v58 }
 0x2f5   :  { %1059 = vmatpush3.bf16.msra.mxu1 %v1349_v9 }
 0x2f6   :  { %1060 = vmatprep.subr.bf16.mxu1 %v1099_v58 }
 0x2f9   :  { %1062 = vmatpush3.bf16.msra.mxu1 %v1005_v1 }
 0x2fa   :  { %1063 = vmatprep.subr.bf16.mxu1 %v1099_v58 }
 0x2fd   :  { %1065 = vmatpush3.bf16.msra.mxu1 %v1008_v13 }
 0x2fe   :  { %1066 = vmatprep.subr.bf16.mxu1 %v1099_v58 }
 0x301   :  { %1068 = vmatpush3.bf16.msra.mxu1 %v1011_v18 }
 0x3b7   :  { %v369_v22 = vpop.f32.mrb[0].mxu1 }
 0x3b8   :  { %v373_v57 = vmul.f32 %v369_v22, %v369_v22  ;;  %v921_v60 = vpop.f32.mrb[1].mxu1  ;;  %v382_v5 = vrot.slane %v369_v22, %v381_v4 }
 0x3b9   :  { %v448_v60 = vld [vmem:[%s1547_s2 + $0x48] sm:$0xff] }
 0x3ba   :  { %v375_v61 = vrot.slane %v373_v57, 7  ;;  %v383_v8 = vsub.f32 %v266_v39, %v382_v5  ;;  %v384_v9 = vsub.f32 %v267_v40, %v382_v5  ;;  %v1015_v39 = vpack.c.bf16 %v440_v36, %v439_v33  ;;  %v447_v57 = vld [vmem:[%s1547_s2 + $0x40] sm:$0xff]  ;;  %v449_v5 = vld [vmem:[%s1547_s2 + $0x50] sm:$0xff]  ;;  %v454_v33 = vld [vmem:[%s1547_s2 + $0x78] sm:$0xff] }
 0x3bb   :  { %v1017_v40 = vpack.c.bf16 %v458_v38, %v457_v37  ;;  %v1043_v35 = vpack.c.bf16 %v454_v33, %v453_v32 }
 0x3bc   :  { %v377_v62 = vsub.f32 %v369_v22, %v375_v61  ;;  %1016 = vmatpush3.bf16.msra.mxu0 %v1015_v39  ;;  %v1029_v22 = vpack.c.bf16 %v464_v56, %v463_v55  ;;  %v465_v61 = vld [vmem:[%s1547_s2 + $0xd0] sm:$0xff] }
 0x3bd   :  { %1018 = vmatprep.subr.bf16.mxu0 %v1017_v40 }
 0x3be   :  { %v378_v63 = vmax.f32 %v377_v62, 0.0  ;;  %v466_v62 = vld [vmem:[%s1547_s2 + $0xd8] sm:$0xff] }
 0x3c0   :  { %v385_v2 = vadd.f32 1e-05, %v378_v63  ;;  %1020 = vmatpush3.bf16.msra.mxu0 %v1019_v47  ;;  %v1031_v63 = vpack.c.bf16 %v448_v60, %v447_v57 }
 0x3c1   :  { %1022 = vmatprep.subr.bf16.mxu0 %v1021_v48 }
 0x3c2   :  { %1087 = vrsqrt.f32 %v385_v2  ;;  %v1033_v2 = vpack.c.bf16 %v466_v62, %v465_v61 }
 0x3c4   :  { %1024 = vmatpush3.bf16.msra.mxu0 %v1023_v52 }
 0x3c5   :  { %1026 = vmatprep.subr.bf16.mxu0 %v1025_v45 }
 0x3c8   :  { %1028 = vmatpush3.bf16.msra.mxu0 %v1027_v59 }
 0x3c9   :  { %1030 = vmatprep.subr.bf16.mxu0 %v1029_v22 }
 0x3cc   :  { %v1088_v7 = vpop.eup %1087  ;;  %1032 = vmatpush3.bf16.msra.mxu0 %v1031_v63 }
 0x3cd   :  { %v390_v58 = vrot.slane %v1088_v7, %v389_v6  ;;  %v450_v7 = vld [vmem:[%s1547_s2 + $0x58] sm:$0xff]  ;;  %1034 = vmatprep.subr.bf16.mxu0 %v1033_v2 }
 0x3cf   :  { %v391_v0 = vmul.f32 %v390_v58, %v383_v8  ;;  %v392_v1 = vmul.f32 %v390_v58, %v384_v9  ;;  %v467_v8 = vld [vmem:[%s1547_s2 + $0xe0] sm:$0xff]  ;;  %v468_v9 = vld [vmem:[%s1547_s2 + $0xe8] sm:$0xff]  ;;  %v1035_v58 = vpack.c.bf16 %v450_v7, %v449_v5 }
 0x3d1   :  { %v399_v12 = vmul.f32 %v773_v10, %v391_v0  ;;  %v400_v13 = vmul.f32 %v773_v10, %v392_v1  ;;  %v1037_v10 = vpack.c.bf16 %v468_v9, %v467_v8  ;;  %v451_v0 = vld [vmem:[%s1547_s2 + $0x60] sm:$0xff]  ;;  %v452_v1 = vld [vmem:[%s1547_s2 + $0x68] sm:$0xff]  ;;  %1036 = vmatpush3.bf16.msra.mxu0 %v1035_v58 }
 0x3d3   :  { %v1405_v16 = vadd.f32 %v774_v11, %v399_v12  ;;  %v1407_v17 = vadd.f32 %v774_v11, %v400_v13  ;;  %v1039_v11 = vpack.c.bf16 %v452_v1, %v451_v0  ;;  %1038 = vmatprep.subr.bf16.mxu0 %v1037_v10 }
 0x3d5   :  { %v409_v18 = vand.u32 2147483647, %v1405_v16  ;;  %v410_v19 = vand.u32 2147483647, %v1407_v17  ;;  %1040 = vmatpush3.bf16.msra.mxu0 %v1039_v11 }
 0x3d7   :  { %v411_v20 = vmax.f32.f32 %v409_v18, %v410_v19 }
 0x3d9   :  { %v412_v21 = vrot.slane %v411_v20, 4 }
 0x3db   :  { %v413_v24 = vmax.f32 %v411_v20, %v412_v21 }
 0x3dd   :  { %v414_v25 = vrot.slane %v413_v24, 2 }
 0x3df   :  { %v415_v27 = vmax.f32 %v413_v24, %v414_v25  ;;  %v469_v25 = vld [vmem:[%s1547_s2 + $0xf0] sm:$0xff] }
 0x3e1   :  { %v416_v28 = vrot.slane %v415_v27, 1 }
 0x3e3   :  { %v417_v29 = vmax.f32 %v415_v27, %v416_v28  ;;  %v470_v27 = vld [vmem:[%s1547_s2 + $0xf8] sm:$0xff] }
 0x3e4   :  { %v1041_v31 = vpack.c.bf16 %v470_v27, %v469_v25 }
 0x3e5   :  { %418 = vmax.xlane.f32.xlu0 %v417_v29 }
 0x3e6   :  { %1042 = vmatprep.subr.bf16.mxu0 %v1041_v31 }
 0x3e7   :  { %1044 = vmatpush3.bf16.msra.mxu0 %v1043_v35 }
 0x472   :  { %v419_v12 = vpop.xlane.xlu0 %418 }
 0x473   :  { %v420_v13 = vmul.f32 3.051851e-05, %v419_v12 }
 0x475   :  { %vm421_vm10 = vcmp.gt.f32.partialorder %v420_v13, 0.0 }
 0x476   :  { %v422_v18 = vsel %vm421_vm10, %v420_v13, 1.0 }
 0x477   :  { %1089 = vrcp.f32 %v422_v18 }
 0x481   :  { %v1090_v19 = vpop.eup %1089 }
 0x482   :  { %v424_v20 = vmul.f32 %v1090_v19, %v422_v18 }
 0x484   :  { %v425_v21 = vsub.f32 2.0, %v424_v20 }
 0x486   :  { %v426_v24 = vmul.f32 %v1090_v19, %v425_v21 }
 0x488   :  { %v427_v28 = vmul.f32 %v426_v24, %v1405_v16  ;;  %v428_v29 = vmul.f32 %v426_v24, %v1407_v17 }
 0x48a   :  { %v1073_v36 = vround.rtne.f32 %v427_v28  ;;  %v1074_v37 = vround.rtne.f32 %v428_v29 }
 0x48c   :  { %v431_v38 = vmax.f32 %v1073_v36, -32768.0  ;;  %v432_v39 = vmax.f32 %v1074_v37, -32768.0 }
 0x48e   :  { %v433_v40 = vmin.f32 %v431_v38, 32767.0  ;;  %v434_v16 = vmin.f32 %v432_v39, 32767.0 }
 0x490   :  { %v435_v41 = vmul.f32 %v433_v40, %v422_v18  ;;  %v436_v17 = vmul.f32 %v434_v16, %v422_v18 }
 0x492   :  { %v437_v43 = vmax.f32 %v435_v41, 0.0  ;;  %v438_v44 = vmax.f32 %v436_v17, 0.0 }
 0x494   :  { %v473_v46 = vrot.slane %v437_v43, 7  ;;  %v485_v47 = vrot.slane %v437_v43, 1  ;;  %v486_v48 = vrot.slane %v438_v44, 1  ;;  %v474_v49 = vrot.slane %v438_v44, 7 }
 0x496   :  { %476 = vrot.lane.b32.xlu1 %v473_v46, %s1097_s1  ;;  %v487_v50 = vsel %vm145_vm3, %v485_v47, %v486_v48  ;;  %v475_v42 = vsel %vm132_vm1, %v473_v46, %v474_v49  ;;  %v490_v52 = vsel %vm145_vm3, %v486_v48, 0.0 }
 0x497   :  { %v491_v51 = vmul.f32 %v1271_v23, %v487_v50  ;;  %v492_v45 = vmul.f32 %v1277_v26, %v490_v52 }
 0x499   :  { %495 = vrot.lane.b32.xlu0 %v491_v51, %s1097_s1 }
 0x49a   :  { %478 = vrot.lane.b32.xlu1 %v475_v42, %s1097_s1 }
 0x49e   :  { %497 = vrot.lane.b32.xlu1 %v492_v45, %s1097_s1 }
 0x508   :  { %v477_v53 = vpop.permute.xlu1 %476 }
 0x509   :  { %v482_v54 = vsel %vm132_vm1, 0.0, %v477_v53 }
 0x50a   :  { %v483_v55 = vmul.f32 %v1284_v30, %v482_v54 }
 0x50b   :  { %v496_v56 = vpop.permute.xlu0 %495 }
 0x50c   :  { %v479_v59 = vpop.permute.xlu1 %478  ;;  %v501_v23 = vsel %vm162_vm7, %v483_v55, %v496_v56 }
 0x50d   :  { %567 = vmatprep.mubr.f32.mxu0 %v501_v23  ;;  %v484_v22 = vmul.f32 %v1289_v34, %v479_v59 }
 0x50e   :  { %568 = vmatmul.mubr.f32.vlgmr.msra.gmra.mrb[4].mxu0 %v437_v43 }
 0x510   :  { %v498_v57 = vpop.permute.xlu1 %497 }
 0x511   :  { %v502_v60 = vsel %vm162_vm7, %v484_v22, %v498_v57 }
 0x512   :  { %572 = vmatprep.mubr.f32.mxu0 %v502_v60 }
 0x513   :  { %573 = vmatmul.mubr.f32.gmra.mrb[6].mxu0 %v438_v44 }
 0x5e1   :  { %v864_v26 = vpop.f32.mrb[4].mxu0 }
 0x5e2   :  { %v865_v61 = vpop.f32.mrb[5].mxu0 }
 0x5e3   :  { %v866_v62 = vadd.f32 %v865_v61, %v864_v26 }
 0x5e5   :  { %v578_v30 = vand.u32 2147483647, %v866_v62 }
 0x5e6   :  { %v867_v63 = vpop.f32.mrb[6].mxu0 }
 0x5e7   :  { %v868_v2 = vpop.f32.mrb[7].mxu0 }
 0x5e8   :  { %v869_v5 = vadd.f32 %v868_v2, %v867_v63 }
 0x5ea   :  { %v579_v7 = vand.u32 2147483647, %v869_v5 }
 0x5ec   :  { %v580_v8 = vmax.f32.f32 %v578_v30, %v579_v7 }
 0x5ee   :  { %v581_v9 = vrot.slane %v580_v8, 4 }
 0x5f0   :  { %v582_v58 = vmax.f32 %v580_v8, %v581_v9 }
 0x5f2   :  { %v583_v10 = vrot.slane %v582_v58, 2 }
 0x5f4   :  { %v584_v0 = vmax.f32 %v582_v58, %v583_v10 }
 0x5f6   :  { %v585_v1 = vrot.slane %v584_v0, 1 }
 0x5f8   :  { %v586_v34 = vmax.f32 %v584_v0, %v585_v1 }
 0x5fa   :  { %587 = vmax.xlane.f32.xlu1 %v586_v34 }
 0x687   :  { %v588_v11 = vpop.xlane.xlu1 %587 }
 0x688   :  { %v589_v12 = vmul.f32 3.051851e-05, %v588_v11 }
 0x68a   :  { %vm590_vm11 = vcmp.gt.f32.partialorder %v589_v12, 0.0 }
 0x68b   :  { %v591_v13 = vsel %vm590_vm11, %v589_v12, 1.0 }
 0x68c   :  { %1091 = vrcp.f32 %v591_v13 }
 0x696   :  { %v1092_v18 = vpop.eup %1091 }
 0x697   :  { %v593_v19 = vmul.f32 %v1092_v18, %v591_v13 }
 0x699   :  { %v594_v20 = vsub.f32 2.0, %v593_v19 }
 0x69b   :  { %v595_v21 = vmul.f32 %v1092_v18, %v594_v20 }
 0x69d   :  { %v596_v24 = vmul.f32 %v866_v62, %v595_v21  ;;  %v597_v25 = vmul.f32 %v869_v5, %v595_v21  ;;  %v775_v62 = vld [vmem:[%s1548_s5] ss:$0 sm:$0xff] }
 0x69e   :  { %v776_v5 = vld [vmem:[%s1549_s6] ss:$0 sm:$0xff] }
 0x69f   :  { %v1075_v27 = vround.rtne.f32 %v596_v24  ;;  %v1076_v28 = vround.rtne.f32 %v597_v25 }
 0x6a1   :  { %v600_v29 = vmax.f32 %v1075_v27, -32768.0  ;;  %v601_v31 = vmax.f32 %v1076_v28, -32768.0 }
 0x6a3   :  { %v602_v32 = vmin.f32 %v600_v29, 32767.0  ;;  %v603_v33 = vmin.f32 %v601_v31, 32767.0 }
 0x6a5   :  { %v604_v35 = vmul.f32 %v602_v32, %v591_v13  ;;  %v605_v36 = vmul.f32 %v603_v33, %v591_v13 }
 0x6a7   :  { %v608_v37 = vadd.f32 %v605_v36, %v604_v35  ;;  %v615_v38 = vmul.f32 %v604_v35, %v604_v35  ;;  %v616_v39 = vmul.f32 %v605_v36, %v605_v36 }
 0x6a9   :  { %v609_v40 = vrot.slane %v608_v37, 4  ;;  %v617_v16 = vadd.f32 %v616_v39, %v615_v38 }
 0x6ab   :  { %v610_v41 = vadd.f32 %v609_v40, %v608_v37  ;;  %v618_v17 = vrot.slane %v617_v16, 4 }
 0x6ad   :  { %v611_v43 = vrot.slane %v610_v41, 2  ;;  %v619_v44 = vadd.f32 %v618_v17, %v617_v16 }
 0x6af   :  { %v612_v46 = vadd.f32 %v611_v43, %v610_v41  ;;  %v620_v47 = vrot.slane %v619_v44, 2 }
 0x6b1   :  { %v613_v48 = vrot.slane %v612_v46, 1  ;;  %v621_v49 = vadd.f32 %v620_v47, %v619_v44 }
 0x6b3   :  { %v622_v50 = vrot.slane %v621_v49, 1  ;;  %v614_v51 = vadd.f32 %v613_v48, %v612_v46 }
 0x6b5   :  { %v623_v42 = vadd.f32 %v622_v50, %v621_v49 }
 0x6b7   :  { %v624_v52 = vsel %vm132_vm1, %v614_v51, %v623_v42 }
 0x6b8   :  { %955 = vmatmul.mubr.f32.vlgmr.msra.gmra.mrb[2].mxu1 %v624_v52 }
 0x78b   :  { %v691_v45 = vpop.f32.mrb[2].mxu1 }
 0x78c   :  { %v695_v53 = vmul.f32 %v691_v45, %v691_v45  ;;  %v956_v54 = vpop.f32.mrb[3].mxu1  ;;  %v704_v22 = vrot.slane %v691_v45, %v381_v4 }
 0x78e   :  { %v697_v55 = vrot.slane %v695_v53, 7  ;;  %v705_v60 = vsub.f32 %v604_v35, %v704_v22  ;;  %v706_v26 = vsub.f32 %v605_v36, %v704_v22 }
 0x790   :  { %v699_v56 = vsub.f32 %v691_v45, %v697_v55 }
 0x792   :  { %v700_v59 = vmax.f32 %v699_v56, 0.0 }
 0x794   :  { %v707_v23 = vadd.f32 1e-05, %v700_v59 }
 0x796   :  { %1093 = vrsqrt.f32 %v707_v23 }
 0x7a0   :  { %v1094_v57 = vpop.eup %1093 }
 0x7a1   :  { %v712_v61 = vrot.slane %v1094_v57, %v389_v6 }
 0x7a3   :  { %v713_v63 = vmul.f32 %v712_v61, %v705_v60  ;;  %v714_v2 = vmul.f32 %v712_v61, %v706_v26 }
 0x7a5   :  { %v721_v30 = vmul.f32 %v775_v62, %v713_v63  ;;  %v722_v7 = vmul.f32 %v775_v62, %v714_v2 }
 0x7a7   :  { %v729_v8 = vadd.f32 %v776_v5, %v721_v30  ;;  %v730_v4 = vadd.f32 %v776_v5, %v722_v7 }
 0x7a9   :  { %v731_v9 = vand.u32 2147483647, %v729_v8  ;;  %v732_v58 = vand.u32 2147483647, %v730_v4 }
 0x7ab   :  { %v733_v10 = vmax.f32.f32 %v731_v9, %v732_v58 }
 0x7ad   :  { %v734_v0 = vrot.slane %v733_v10, 4 }
 0x7af   :  { %v735_v3 = vmax.f32 %v733_v10, %v734_v0 }
 0x7b1   :  { %v736_v6 = vrot.slane %v735_v3, 2 }
 0x7b3   :  { %v737_v1 = vmax.f32 %v735_v3, %v736_v6 }
 0x7b5   :  { %v738_v34 = vrot.slane %v737_v1, 1 }
 0x7b7   :  { %v739_v11 = vmax.f32 %v737_v1, %v738_v34 }
 0x7b9   :  { %740 = vmax.xlane.f32.xlu0 %v739_v11 }
 0x846   :  { %v741_v12 = vpop.xlane.xlu0 %740 }
 0x847   :  { %v742_v13 = vmul.f32 3.051851e-05, %v741_v12 }
 0x849   :  { %vm743_vm12 = vcmp.gt.f32.partialorder %v742_v13, 0.0 }
 0x84a   :  { %v744_v18 = vsel %vm743_vm12, %v742_v13, 1.0 }
 0x84b   :  { %1095 = vrcp.f32 %v744_v18 }
 0x855   :  { %v1096_v19 = vpop.eup %1095 }
 0x856   :  { %v746_v20 = vmul.f32 %v1096_v19, %v744_v18 }
 0x858   :  { %v747_v21 = vsub.f32 2.0, %v746_v20 }
 0x85a   :  { %v748_v24 = vmul.f32 %v1096_v19, %v747_v21 }
 0x85c   :  { %v749_v25 = vmul.f32 %v748_v24, %v729_v8  ;;  %v750_v27 = vmul.f32 %v748_v24, %v730_v4 }
 0x85e   :  { %v1077_v28 = vround.rtne.f32 %v749_v25  ;;  %v1078_v29 = vround.rtne.f32 %v750_v27 }
 0x860   :  { %v753_v31 = vmax.f32 %v1077_v28, -32768.0  ;;  %v754_v32 = vmax.f32 %v1078_v29, -32768.0 }
 0x862   :  { %v755_v33 = vmin.f32 %v753_v31, 32767.0  ;;  %v756_v35 = vmin.f32 %v754_v32, 32767.0 }
 0x864   :  { %v757_v36 = vmul.f32 %v755_v33, %v744_v18  ;;  %v758_v37 = vmul.f32 %v756_v35, %v744_v18 }
 0x866   :  { %v759_v38 = vadd.f32 %v757_v36, %v1260_v14  ;;  %v760_v39 = vadd.f32 %v758_v37, %v1262_v15 }
 0x868   :  { %v761_v40 = vmax.f32 %v759_v38, 0.0  ;;  %v762_v16 = vmax.f32 %v760_v39, 0.0 }
 0x86a   :  { %763 = vst [vmem:[%s1550_s8] sm:$0xff] %v761_v40  ;;  %764 = vst [vmem:[%s1550_s8 + $0x8] sm:$0xff] %v762_v16 }

</bundles_post_ra>
